<compile_context>
chip_gen: v6e
topology: v6e:2x2x1
jax: 0.10.0
libtpu: 0.0.40
codegen_flags: <defaults>
</compile_context>

<pallas_src>
import jax
import jax.numpy as jnp
from jax.experimental import pallas as pl
from jax.experimental.pallas import tpu as pltpu

IN_DIM = 512
OUT_DIM = 768
TM_MAX = 512  # row-tile cap: MXU-edge aligned (v5e 4x128, v6e/v7x 2x256)


def _round_up(a, b):
    return (a + b - 1) // b * b


def _choose_tm(m):
    """Row tile: big enough to amortize per-step overhead, small enough to
    keep >= 2 grid steps on mid-size batches (v7x megacore + pipelining)."""
    if m <= 256:
        return max(8, _round_up(m, 8))       # single sublane-aligned tile
    return min(TM_MAX, _round_up(pl.cdiv(m, 2), 256))


def _ff_encoder_kernel(x_ref, w1_ref, b1_ref, w2_ref, b2_ref, o_ref, h_ref):
    # Layer 1: cast the f32 activation tile to bf16 on the VPU (filler under
    # the MXU); bf16 x bf16 matmul with f32 accumulation.
    h = jnp.dot(x_ref[...].astype(jnp.bfloat16), w1_ref[...],
                preferred_element_type=jnp.float32)
    # Bias + ReLU in f32 on the VPU; stage in bf16 VMEM (halves vst/vld and
    # is exactly the dtype the second MXU pass needs).
    h_ref[...] = jnp.maximum(h + b1_ref[...], 0.0).astype(jnp.bfloat16)
    # Layer 2: bf16 staged hidden x bf16 weights, f32 accumulation.
    o = jnp.dot(h_ref[...], w2_ref[...], preferred_element_type=jnp.float32)
    o_ref[...] = jnp.maximum(o + b2_ref[...], 0.0).astype(o_ref.dtype)


def ff_encoder_forward(x, w1, b1, w2, b2, out_dtype=None):
    """FFEncoder forward (bn=False, do=0).

    x: any shape with size divisible by 512 and row count (size // 512)
    divisible by 7.  w1:(512,H), b1:(H,), w2:(H,768), b2:(768,).
    Pass bf16 weights to avoid per-call casts.  Returns (-1, 7, 768).
    """
    x2d = x.reshape(-1, IN_DIM)
    m = x2d.shape[0]
    assert m % 7 == 0, f"row count {m} must be divisible by 7"
    hidden = w1.shape[1]
    out_dtype = x.dtype if out_dtype is None else out_dtype

    tm = _choose_tm(m)
    grid = (pl.cdiv(m, tm),)

    # Weight casts only if the caller didn't already hoist them.
    w1_b = w1 if w1.dtype == jnp.bfloat16 else w1.astype(jnp.bfloat16)
    w2_b = w2 if w2.dtype == jnp.bfloat16 else w2.astype(jnp.bfloat16)
    b1_2d = b1.reshape(1, hidden).astype(jnp.float32)
    b2_2d = b2.reshape(1, OUT_DIM).astype(jnp.float32)

    flops = 2 * m * (IN_DIM * hidden + hidden * OUT_DIM)
    bytes_accessed = (m * IN_DIM * jnp.dtype(x2d.dtype).itemsize
                      + w1_b.size * 2 + w2_b.size * 2      # bf16 weights
                      + (hidden + OUT_DIM) * 4             # f32 biases
                      + m * OUT_DIM * jnp.dtype(out_dtype).itemsize)

    out2d = pl.pallas_call(
        _ff_encoder_kernel,
        out_shape=jax.ShapeDtypeStruct((m, OUT_DIM), out_dtype),
        grid=grid,
        in_specs=[
            pl.BlockSpec((tm, IN_DIM), lambda i: (i, 0)),       # x row tile
            pl.BlockSpec((IN_DIM, hidden), lambda i: (0, 0)),   # w1 (resident)
            pl.BlockSpec((1, hidden), lambda i: (0, 0)),        # b1 (resident)
            pl.BlockSpec((hidden, OUT_DIM), lambda i: (0, 0)),  # w2 (resident)
            pl.BlockSpec((1, OUT_DIM), lambda i: (0, 0)),       # b2 (resident)
        ],
        out_specs=pl.BlockSpec((tm, OUT_DIM), lambda i: (i, 0)),
        scratch_shapes=[pltpu.VMEM((tm, hidden), jnp.bfloat16)],
        compiler_params=pltpu.CompilerParams(
            dimension_semantics=("parallel",)),
        cost_estimate=pl.CostEstimate(
            flops=flops, transcendentals=0, bytes_accessed=bytes_accessed),
    )(x2d, w1_b, b1_2d, w2_b, b2_2d)

    return out2d.reshape(-1, 7, OUT_DIM)


if __name__ == "__main__":
    hidden = 512  # module default
    key = jax.random.PRNGKey(0)
    kx, kw1, kb1, kw2, kb2 = jax.random.split(key, 5)

    # Deterministic "Linear" params (stored as (in, out) for the kernel).
    w1 = jax.random.normal(kw1, (IN_DIM, hidden), dtype=jnp.float32) * 0.02
    b1 = jax.random.normal(kb1, (hidden,), dtype=jnp.float32) * 0.01
    w2 = jax.random.normal(kw2, (hidden, OUT_DIM), dtype=jnp.float32) * 0.02
    b2 = jax.random.normal(kb2, (OUT_DIM,), dtype=jnp.float32) * 0.01

    # Hoisted (one-time) bf16 weight casts -- not paid per forward call.
    w1_b16 = w1.astype(jnp.bfloat16)
    w2_b16 = w2.astype(jnp.bfloat16)

    ff = jax.jit(ff_encoder_forward)

    def _reference(x):
        x2d = x.reshape(-1, IN_DIM).astype(jnp.float32)
        h = jnp.maximum(x2d @ w1 + b1, 0.0)
        o = jnp.maximum(h @ w2 + b2, 0.0)
        return o.reshape(-1, 7, OUT_DIM)

    # Case 1: tiny batch -> single 16-row sublane-aligned tile, ragged write.
    x_small = jax.random.normal(kx, (2, 7, IN_DIM), dtype=jnp.float32)
    out_small = jax.block_until_ready(ff(x_small, w1_b16, b1, w2_b16, b2))
    assert out_small.shape == (2, 7, OUT_DIM), out_small.shape
    # bf16 MXU operands with f32 accumulation -> compare at bf16 tolerance.
    assert jnp.allclose(out_small, _reference(x_small), atol=2e-2, rtol=2e-2), \
        "small-batch mismatch vs reference"

    # Case 2: m = 294 rows -> tm = 256, grid = (2,), ragged last block
    # (exercises multi-step pipeline + masked boundary writes, no padding).
    x_big = jax.random.normal(kx, (42, 7, IN_DIM), dtype=jnp.float32)
    out_big = jax.block_until_ready(ff(x_big, w1_b16, b1, w2_b16, b2))
    assert out_big.shape == (42, 7, OUT_DIM), out_big.shape
    assert jnp.allclose(out_big, _reference(x_big), atol=2e-2, rtol=2e-2), \
        "multi-tile mismatch vs reference"

    print("KERNEL_OK")
</pallas_src>

<mosaic_0001>
module attributes {stable_mosaic.version = 11 : i64} {
  func.func @_ff_encoder_kernel(%arg0: i32, %arg1: memref<16x512xf32, #tpu.memory_space<vmem>>, %arg2: memref<512x512xbf16, #tpu.memory_space<vmem>>, %arg3: memref<1x512xf32, #tpu.memory_space<vmem>>, %arg4: memref<512x768xbf16, #tpu.memory_space<vmem>>, %arg5: memref<1x768xf32, #tpu.memory_space<vmem>>, %arg6: memref<16x768xf32, #tpu.memory_space<vmem>>, %arg7: memref<16x512xbf16, #tpu.memory_space<vmem>>) attributes {dimension_semantics = [#tpu.dimension_semantics<parallel>], iteration_bounds = array<i64: 1>, scalar_prefetch = 0 : i64, scratch_operands = 1 : i64, tpu.core_type = #tpu.core_type<tc>, window_params = [{transform_indices = @transform_0, window_bounds = array<i64: 16, 512>}, {pipeline_mode = #tpu.pipeline_mode<synchronous>, transform_indices = @transform_1, window_bounds = array<i64: 512, 512>}, {pipeline_mode = #tpu.pipeline_mode<synchronous>, transform_indices = @transform_2, window_bounds = array<i64: 1, 512>}, {pipeline_mode = #tpu.pipeline_mode<synchronous>, transform_indices = @transform_3, window_bounds = array<i64: 512, 768>}, {pipeline_mode = #tpu.pipeline_mode<synchronous>, transform_indices = @transform_4, window_bounds = array<i64: 1, 768>}, {transform_indices = @transform_5, window_bounds = array<i64: 16, 768>}]} {
    %c0 = arith.constant 0 : index
    %c0_0 = arith.constant 0 : index
    %0 = vector.load %arg1[%c0, %c0_0] : memref<16x512xf32, #tpu.memory_space<vmem>>, vector<16x512xf32>
    %1 = arith.truncf %0 : vector<16x512xf32> to vector<16x512xbf16>
    %c0_1 = arith.constant 0 : index
    %c0_2 = arith.constant 0 : index
    %2 = vector.load %arg2[%c0_1, %c0_2] : memref<512x512xbf16, #tpu.memory_space<vmem>>, vector<512x512xbf16>
    %cst = arith.constant dense<0.000000e+00> : vector<16x512xf32>
    %3 = tpu.matmul %1, %2, %cst {dimension_numbers = #tpu.dot_dimension_numbers<[1], [0], [0], [1], [0, 0, 1, 1], [], []>} : vector<16x512xbf16>, vector<512x512xbf16>, vector<16x512xf32> -> vector<16x512xf32>
    %c0_3 = arith.constant 0 : index
    %c0_4 = arith.constant 0 : index
    %4 = vector.load %arg3[%c0_3, %c0_4] : memref<1x512xf32, #tpu.memory_space<vmem>>, vector<1x512xf32>
    %5 = vector.broadcast %4 : vector<1x512xf32> to vector<16x512xf32>
    %6 = arith.addf %3, %5 : vector<16x512xf32>
    %cst_5 = arith.constant 0.000000e+00 : f32
    %7 = vector.broadcast %cst_5 : f32 to vector<16x512xf32>
    %8 = arith.maximumf %6, %7 : vector<16x512xf32>
    %9 = arith.truncf %8 : vector<16x512xf32> to vector<16x512xbf16>
    %c0_6 = arith.constant 0 : index
    %c0_7 = arith.constant 0 : index
    %10 = vector.load %arg7[%c0_6, %c0_7] : memref<16x512xbf16, #tpu.memory_space<vmem>>, vector<16x512xbf16>
    tpu.vector_store %arg7[%c0_6, %c0_7], %9 {strides = array<i32>} : memref<16x512xbf16, #tpu.memory_space<vmem>>, vector<16x512xbf16>,
    %c0_8 = arith.constant 0 : index
    %c0_9 = arith.constant 0 : index
    %11 = vector.load %arg7[%c0_8, %c0_9] : memref<16x512xbf16, #tpu.memory_space<vmem>>, vector<16x512xbf16>
    %c0_10 = arith.constant 0 : index
    %c0_11 = arith.constant 0 : index
    %12 = vector.load %arg4[%c0_10, %c0_11] : memref<512x768xbf16, #tpu.memory_space<vmem>>, vector<512x768xbf16>
    %cst_12 = arith.constant dense<0.000000e+00> : vector<16x768xf32>
    %13 = tpu.matmul %11, %12, %cst_12 {dimension_numbers = #tpu.dot_dimension_numbers<[1], [0], [0], [1], [0, 0, 1, 1], [], []>} : vector<16x512xbf16>, vector<512x768xbf16>, vector<16x768xf32> -> vector<16x768xf32>
    %c0_13 = arith.constant 0 : index
    %c0_14 = arith.constant 0 : index
    %14 = vector.load %arg5[%c0_13, %c0_14] : memref<1x768xf32, #tpu.memory_space<vmem>>, vector<1x768xf32>
    %15 = vector.broadcast %14 : vector<1x768xf32> to vector<16x768xf32>
    %16 = arith.addf %13, %15 : vector<16x768xf32>
    %cst_15 = arith.constant 0.000000e+00 : f32
    %17 = vector.broadcast %cst_15 : f32 to vector<16x768xf32>
    %18 = arith.maximumf %16, %17 : vector<16x768xf32>
    %c0_16 = arith.constant 0 : index
    %c0_17 = arith.constant 0 : index
    %19 = vector.load %arg6[%c0_16, %c0_17] : memref<16x768xf32, #tpu.memory_space<vmem>>, vector<16x768xf32>
    tpu.vector_store %arg6[%c0_16, %c0_17], %18 {strides = array<i32>} : memref<16x768xf32, #tpu.memory_space<vmem>>, vector<16x768xf32>,
    return
  }
  func.func @transform_0(%arg0: i32) -> (i32, i32) {
    %c0_i32 = arith.constant 0 : i32
    %c0_i32_0 = arith.constant 0 : i32
    return %arg0, %c0_i32 : i32, i32
  }
  func.func @transform_1(%arg0: i32) -> (i32, i32) {
    %c0_i32 = arith.constant 0 : i32
    %c0_i32_0 = arith.constant 0 : i32
    %c0_i32_1 = arith.constant 0 : i32
    return %c0_i32, %c0_i32_0 : i32, i32
  }
  func.func @transform_2(%arg0: i32) -> (i32, i32) {
    %c0_i32 = arith.constant 0 : i32
    %c0_i32_0 = arith.constant 0 : i32
    %c0_i32_1 = arith.constant 0 : i32
    return %c0_i32, %c0_i32_0 : i32, i32
  }
  func.func @transform_3(%arg0: i32) -> (i32, i32) {
    %c0_i32 = arith.constant 0 : i32
    %c0_i32_0 = arith.constant 0 : i32
    %c0_i32_1 = arith.constant 0 : i32
    return %c0_i32, %c0_i32_0 : i32, i32
  }
  func.func @transform_4(%arg0: i32) -> (i32, i32) {
    %c0_i32 = arith.constant 0 : i32
    %c0_i32_0 = arith.constant 0 : i32
    %c0_i32_1 = arith.constant 0 : i32
    return %c0_i32, %c0_i32_0 : i32, i32
  }
  func.func @transform_5(%arg0: i32) -> (i32, i32) {
    %c0_i32 = arith.constant 0 : i32
    %c0_i32_0 = arith.constant 0 : i32
    return %arg0, %c0_i32 : i32, i32
  }
}

</mosaic_0001>

<bundles_post_ra>
// kernel: ff_encoder_forward.1
= control target key start
LH: loop header
LB: loop body
LE: loop exit
PB: predicated region body
PF: predicated region fallthrough
CT: control target
= control target key end

     0   :  { %10 = vsyncpa [#allocation4], 0  ;;  %s3586_s0 = inlined_call_operand.vmem [shape: f32[14,512], index: 0, kind: input, shape index: {}]   ;;  %s3587_s1 = inlined_call_operand.hbm [shape: bf16[512,512], index: 1, kind: input, shape index: {}]   ;;  %s3588_s2 = inlined_call_operand.vmem [shape: f32[1,512], index: 2, kind: input, shape index: {}]   ;;  %s3589_s3 = inlined_call_operand.hbm [shape: bf16[512,768], index: 3, kind: input, shape index: {}]   ;;  %s3590_s4 = inlined_call_operand.vmem [shape: f32[1,768], index: 4, kind: input, shape index: {}]   ;;  %s3591_s5 = inlined_call_operand.vmem [shape: f32[14,768], index: 5, kind: output, shape index: {}]  }
   0x1   :  { %11 = vsyncpa [#allocation6], 0  ;;  %s3420_s18 = smov [#allocation3]  }
   0x2   :  { %s19_s19 = sshll.u32 %s3420_s18, 4  ;;  %s20_s19 = int_to_ptr.vmem [resolvable:$true] %s19_s19 }
   0x3   :  { %s3384_s20 = scalar_lea.vmem %s20_s19, 16384  ;;  %p3389_p1 = scmp.lt.s32.totalorder %s20_s19, %s20_s19 }
   0x4   :  { %p3385_p0 = scmp.ne.s32.totalorder %s20_s19, %s3384_s20  ;;  %p3390_p2 = scmp.lt.s32.totalorder %s3384_s20, %s3384_s20 }
   0x6   :  { %p3391_p3 = por %p3390_p2, %p3389_p1 }
   0x8   :  { %p3392_p4 = pnand %p3391_p3, %p3385_p0 }
   0xa   :  { %3395 = shalt.err (!%p3392_p4)
}
   0xb   :  { %s3421_s21 = smov 256   ;;  %s3422_s22 = smov 16  }
   0xc   :  { %25 = dma.hbm_to_vmem [thread:$0]  %s3587_s1, 16384, %s20_s19, [#allocation4], %s3421_s21, %s3421_s21, %s3422_s22  }
   0xd   :  { %s3423_s25 = smov [#allocation5]  }
   0xe   :  { %s33_s26 = sshll.u32 %s3423_s25, 4  ;;  %s34_s26 = int_to_ptr.vmem [resolvable:$true] %s33_s26 }
   0xf   :  { %s3404_s27 = scalar_lea.vmem %s34_s26, 24576  ;;  %p3409_p6 = scmp.lt.s32.totalorder %s34_s26, %s34_s26 }
  0x10   :  { %p3405_p5 = scmp.ne.s32.totalorder %s34_s26, %s3404_s27  ;;  %p3410_p7 = scmp.lt.s32.totalorder %s3404_s27, %s3404_s27 }
  0x12   :  { %p3411_p8 = por %p3410_p7, %p3409_p6 }
  0x14   :  { %p3412_p9 = pnand %p3411_p8, %p3405_p5 }
  0x16   :  { %3415 = shalt.err (!%p3412_p9)
}
  0x17   :  { %s3424_s28 = smov 384   ;;  %s3425_s29 = smov 24  }
  0x18   :  { %39 = dma.hbm_to_vmem [thread:$0]  %s3589_s3, 24576, %s34_s26, [#allocation6], %s3424_s28, %s3424_s28, %s3425_s29  }
  0x19   :  { %3416 = dma.done.wait [#allocation4], 16384  }
  0x1a   :  { %3417 = vsyncadd [#allocation4], 4294950912 }
  0x1b   :  { %3418 = dma.done.wait [#allocation6], 24576  }
  0x1c   :  { %3419 = vsyncadd [#allocation6], 4294942720  ;;  %v2896_v0 = vld [vmem:[#allocation3 + $0xe4] ss:$16 sps:$4 sm:$0xff]   ;;  %v2900_v2 = vld [vmem:[#allocation3 + $0xe0] ss:$16 sps:$4 sm:$0xff]  }
  0x1d   :  { %v2898_v1 = vld [vmem:[#allocation3 + $0x2e4] ss:$16 sps:$4 sm:$0xff]   ;;  %850 = vmatprep.subr.bf16.mxu0 %v2896_v0  ;;  %v2901_v3 = vld [vmem:[#allocation3 + $0x2e0] ss:$16 sps:$4 sm:$0xff]   ;;  %v49_v46 = vld [vmem:[%s3586_s0 + $0x8] sm:$0xff] }
  0x1e   :  { %893 = vmatprep.subr.bf16.mxu1 %v2898_v1  ;;  %v2902_v4 = vld [vmem:[#allocation3 + $0xc4] ss:$16 sps:$4 sm:$0xff]   ;;  %851 = vmatpush1.bf16.msra.mxu0 %v2900_v2  ;;  %v2906_v6 = vld [vmem:[#allocation3 + $0xc0] ss:$16 sps:$4 sm:$0xff]   ;;  %v53_v47 = vld [vmem:[%s3586_s0 + $0x28] sm:$0xff] }
  0x1f   :  { %894 = vmatpush1.bf16.msra.mxu1 %v2901_v3  ;;  %v2904_v5 = vld [vmem:[#allocation3 + $0x2c4] ss:$16 sps:$4 sm:$0xff]   ;;  %852 = vmatprep.subr.bf16.mxu0 %v2902_v4  ;;  %v2907_v7 = vld [vmem:[#allocation3 + $0x2c0] ss:$16 sps:$4 sm:$0xff]   ;;  %v51_v48 = vld [vmem:[%s3586_s0 + $0x18] sm:$0xff]  ;;  %v57_v53 = vpack.c.bf16 %v53_v47, %v49_v46 }
  0x20   :  { %895 = vmatprep.subr.bf16.mxu1 %v2904_v5  ;;  %v2908_v8 = vld [vmem:[#allocation3 + $0xa4] ss:$16 sps:$4 sm:$0xff]   ;;  %v2912_v10 = vld [vmem:[#allocation3 + $0xa0] ss:$16 sps:$4 sm:$0xff]   ;;  %v55_v49 = vld [vmem:[%s3586_s0 + $0x38] sm:$0xff] }
  0x21   :  { %v2910_v9 = vld [vmem:[#allocation3 + $0x2a4] ss:$16 sps:$4 sm:$0xff]   ;;  %v2913_v11 = vld [vmem:[#allocation3 + $0x2a0] ss:$16 sps:$4 sm:$0xff]   ;;  %v59_v54 = vpack.c.bf16 %v55_v49, %v51_v48  ;;  %882 = vmatprep.mubr.bf16.mxu0 %v57_v53  ;;  %v3040_v46 = vld [vmem:[#allocation3 + $0x1e8] ss:$16 sps:$4 sm:$0xff]  }
  0x22   :  { %853 = vmatpush1.bf16.msra.mxu0 %v2906_v6  ;;  %v2914_v12 = vld [vmem:[#allocation3 + $0x84] ss:$16 sps:$4 sm:$0xff]   ;;  %v2918_v14 = vld [vmem:[#allocation3 + $0x80] ss:$16 sps:$4 sm:$0xff]   ;;  %v3043_v47 = vld [vmem:[#allocation3 + $0x3e8] ss:$16 sps:$4 sm:$0xff]  }
  0x23   :  { %896 = vmatpush1.bf16.msra.mxu1 %v2907_v7  ;;  %854 = vmatprep.subr.bf16.mxu0 %v2908_v8  ;;  %v2916_v13 = vld [vmem:[#allocation3 + $0x284] ss:$16 sps:$4 sm:$0xff]   ;;  %v2919_v15 = vld [vmem:[#allocation3 + $0x280] ss:$16 sps:$4 sm:$0xff]   ;;  %v3048_v48 = vld [vmem:[#allocation3 + $0x1cc] ss:$16 sps:$4 sm:$0xff]  }
  0x24   :  { %897 = vmatprep.subr.bf16.mxu1 %v2910_v9  ;;  %v2920_v16 = vld [vmem:[#allocation3 + $0x64] ss:$16 sps:$4 sm:$0xff]   ;;  %v2924_v18 = vld [vmem:[#allocation3 + $0x60] ss:$16 sps:$4 sm:$0xff]   ;;  %925 = vmatprep.mubr.bf16.mxu1 %v59_v54  ;;  %v3051_v49 = vld [vmem:[#allocation3 + $0x3cc] ss:$16 sps:$4 sm:$0xff]  }
  0x25   :  { %v2922_v17 = vld [vmem:[#allocation3 + $0x264] ss:$16 sps:$4 sm:$0xff]   ;;  %v2925_v19 = vld [vmem:[#allocation3 + $0x260] ss:$16 sps:$4 sm:$0xff]  }
  0x26   :  { %855 = vmatpush1.bf16.msra.mxu0 %v2912_v10  ;;  %v2926_v20 = vld [vmem:[#allocation3 + $0x44] ss:$16 sps:$4 sm:$0xff]   ;;  %v2930_v22 = vld [vmem:[#allocation3 + $0x40] ss:$16 sps:$4 sm:$0xff]   ;;  %v2994_v10 = vld [vmem:[#allocation3 + $0xec] ss:$16 sps:$4 sm:$0xff]  }
  0x27   :  { %898 = vmatpush1.bf16.msra.mxu1 %v2913_v11  ;;  %856 = vmatprep.subr.bf16.mxu0 %v2914_v12  ;;  %v2928_v21 = vld [vmem:[#allocation3 + $0x244] ss:$16 sps:$4 sm:$0xff]   ;;  %v2931_v23 = vld [vmem:[#allocation3 + $0x240] ss:$16 sps:$4 sm:$0xff]   ;;  %v2997_v11 = vld [vmem:[#allocation3 + $0x2ec] ss:$16 sps:$4 sm:$0xff]  }
  0x28   :  { %899 = vmatprep.subr.bf16.mxu1 %v2916_v13  ;;  %v2932_v24 = vld [vmem:[#allocation3 + $0x24] ss:$16 sps:$4 sm:$0xff]   ;;  %v2936_v26 = vld [vmem:[#allocation3 + $0x20] ss:$16 sps:$4 sm:$0xff]  }
  0x29   :  { %v2934_v25 = vld [vmem:[#allocation3 + $0x224] ss:$16 sps:$4 sm:$0xff]   ;;  %v2937_v27 = vld [vmem:[#allocation3 + $0x220] ss:$16 sps:$4 sm:$0xff]  }
  0x2a   :  { %857 = vmatpush1.bf16.msra.mxu0 %v2918_v14  ;;  %v2938_v28 = vld [vmem:[#allocation3 + $0x4] ss:$16 sps:$4 sm:$0xff]   ;;  %v2942_v30 = vld [vmem:[#allocation3] ss:$16 sps:$4 sm:$0xff]   ;;  %v2992_v14 = vld [vmem:[#allocation3 + $0xe8] ss:$16 sps:$4 sm:$0xff]  }
  0x2b   :  { %900 = vmatpush1.bf16.msra.mxu1 %v2919_v15  ;;  %858 = vmatprep.subr.bf16.mxu0 %v2920_v16  ;;  %v2940_v29 = vld [vmem:[#allocation3 + $0x204] ss:$16 sps:$4 sm:$0xff]   ;;  %v2943_v31 = vld [vmem:[#allocation3 + $0x200] ss:$16 sps:$4 sm:$0xff]   ;;  %v2995_v15 = vld [vmem:[#allocation3 + $0x2e8] ss:$16 sps:$4 sm:$0xff]  }
  0x2c   :  { %901 = vmatprep.subr.bf16.mxu1 %v2922_v17  ;;  %v2944_v32 = vld [vmem:[#allocation3 + $0x1e4] ss:$16 sps:$4 sm:$0xff]   ;;  %v2948_v34 = vld [vmem:[#allocation3 + $0x1e0] ss:$16 sps:$4 sm:$0xff]   ;;  %v3000_v16 = vld [vmem:[#allocation3 + $0xcc] ss:$16 sps:$4 sm:$0xff]  }
  0x2d   :  { %v2946_v33 = vld [vmem:[#allocation3 + $0x3e4] ss:$16 sps:$4 sm:$0xff]   ;;  %v2949_v35 = vld [vmem:[#allocation3 + $0x3e0] ss:$16 sps:$4 sm:$0xff]   ;;  %v3003_v17 = vld [vmem:[#allocation3 + $0x2cc] ss:$16 sps:$4 sm:$0xff]  }
  0x2e   :  { %859 = vmatpush1.bf16.msra.mxu0 %v2924_v18  ;;  %v2950_v36 = vld [vmem:[#allocation3 + $0x1c4] ss:$16 sps:$4 sm:$0xff]   ;;  %v2954_v38 = vld [vmem:[#allocation3 + $0x1c0] ss:$16 sps:$4 sm:$0xff]   ;;  %v2998_v18 = vld [vmem:[#allocation3 + $0xc8] ss:$16 sps:$4 sm:$0xff]  }
  0x2f   :  { %902 = vmatpush1.bf16.msra.mxu1 %v2925_v19  ;;  %860 = vmatprep.subr.bf16.mxu0 %v2926_v20  ;;  %v2952_v37 = vld [vmem:[#allocation3 + $0x3c4] ss:$16 sps:$4 sm:$0xff]   ;;  %v2955_v39 = vld [vmem:[#allocation3 + $0x3c0] ss:$16 sps:$4 sm:$0xff]   ;;  %v3001_v19 = vld [vmem:[#allocation3 + $0x2c8] ss:$16 sps:$4 sm:$0xff]  }
  0x30   :  { %903 = vmatprep.subr.bf16.mxu1 %v2928_v21  ;;  %v2956_v40 = vld [vmem:[#allocation3 + $0x1a4] ss:$16 sps:$4 sm:$0xff]   ;;  %v2960_v42 = vld [vmem:[#allocation3 + $0x1a0] ss:$16 sps:$4 sm:$0xff]   ;;  %v3006_v20 = vld [vmem:[#allocation3 + $0xac] ss:$16 sps:$4 sm:$0xff]  }
  0x31   :  { %v2958_v41 = vld [vmem:[#allocation3 + $0x3a4] ss:$16 sps:$4 sm:$0xff]   ;;  %v2961_v43 = vld [vmem:[#allocation3 + $0x3a0] ss:$16 sps:$4 sm:$0xff]   ;;  %v3009_v21 = vld [vmem:[#allocation3 + $0x2ac] ss:$16 sps:$4 sm:$0xff]  }
  0x32   :  { %861 = vmatpush1.bf16.msra.mxu0 %v2930_v22  ;;  %v2962_v44 = vld [vmem:[#allocation3 + $0x184] ss:$16 sps:$4 sm:$0xff]   ;;  %v2966_v50 = vld [vmem:[#allocation3 + $0x180] ss:$16 sps:$4 sm:$0xff]   ;;  %v3004_v22 = vld [vmem:[#allocation3 + $0xa8] ss:$16 sps:$4 sm:$0xff]  }
  0x33   :  { %904 = vmatpush1.bf16.msra.mxu1 %v2931_v23  ;;  %862 = vmatprep.subr.bf16.mxu0 %v2932_v24  ;;  %v2964_v45 = vld [vmem:[#allocation3 + $0x384] ss:$16 sps:$4 sm:$0xff]   ;;  %v2967_v51 = vld [vmem:[#allocation3 + $0x380] ss:$16 sps:$4 sm:$0xff]   ;;  %v3007_v23 = vld [vmem:[#allocation3 + $0x2a8] ss:$16 sps:$4 sm:$0xff]  }
  0x34   :  { %905 = vmatprep.subr.bf16.mxu1 %v2934_v25  ;;  %v2968_v52 = vld [vmem:[#allocation3 + $0x164] ss:$16 sps:$4 sm:$0xff]   ;;  %v2972_v56 = vld [vmem:[#allocation3 + $0x160] ss:$16 sps:$4 sm:$0xff]   ;;  %v3012_v24 = vld [vmem:[#allocation3 + $0x8c] ss:$16 sps:$4 sm:$0xff]  }
  0x35   :  { %v2970_v55 = vld [vmem:[#allocation3 + $0x364] ss:$16 sps:$4 sm:$0xff]   ;;  %v2973_v57 = vld [vmem:[#allocation3 + $0x360] ss:$16 sps:$4 sm:$0xff]   ;;  %v3015_v25 = vld [vmem:[#allocation3 + $0x28c] ss:$16 sps:$4 sm:$0xff]  }
  0x36   :  { %863 = vmatpush1.bf16.msra.mxu0 %v2936_v26  ;;  %v2974_v58 = vld [vmem:[#allocation3 + $0x144] ss:$16 sps:$4 sm:$0xff]   ;;  %v2978_v60 = vld [vmem:[#allocation3 + $0x140] ss:$16 sps:$4 sm:$0xff]   ;;  %v3010_v26 = vld [vmem:[#allocation3 + $0x88] ss:$16 sps:$4 sm:$0xff]  }
  0x37   :  { %906 = vmatpush1.bf16.msra.mxu1 %v2937_v27  ;;  %864 = vmatprep.subr.bf16.mxu0 %v2938_v28  ;;  %v2976_v59 = vld [vmem:[#allocation3 + $0x344] ss:$16 sps:$4 sm:$0xff]   ;;  %v2979_v61 = vld [vmem:[#allocation3 + $0x340] ss:$16 sps:$4 sm:$0xff]   ;;  %v3013_v27 = vld [vmem:[#allocation3 + $0x288] ss:$16 sps:$4 sm:$0xff]  }
  0x38   :  { %907 = vmatprep.subr.bf16.mxu1 %v2940_v29  ;;  %v2980_v62 = vld [vmem:[#allocation3 + $0x124] ss:$16 sps:$4 sm:$0xff]   ;;  %v2984_v0 = vld [vmem:[#allocation3 + $0x120] ss:$16 sps:$4 sm:$0xff]   ;;  %v3018_v28 = vld [vmem:[#allocation3 + $0x6c] ss:$16 sps:$4 sm:$0xff]  }
  0x39   :  { %v2982_v63 = vld [vmem:[#allocation3 + $0x324] ss:$16 sps:$4 sm:$0xff]   ;;  %v2985_v1 = vld [vmem:[#allocation3 + $0x320] ss:$16 sps:$4 sm:$0xff]   ;;  %v3021_v29 = vld [vmem:[#allocation3 + $0x26c] ss:$16 sps:$4 sm:$0xff]  }
  0x3a   :  { %865 = vmatpush1.bf16.msra.mxu0 %v2942_v30  ;;  %v2986_v2 = vld [vmem:[#allocation3 + $0x104] ss:$16 sps:$4 sm:$0xff]   ;;  %v2990_v4 = vld [vmem:[#allocation3 + $0x100] ss:$16 sps:$4 sm:$0xff]   ;;  %v3016_v30 = vld [vmem:[#allocation3 + $0x68] ss:$16 sps:$4 sm:$0xff]  }
  0x3b   :  { %908 = vmatpush1.bf16.msra.mxu1 %v2943_v31  ;;  %866 = vmatprep.subr.bf16.mxu0 %v2944_v32  ;;  %v2988_v3 = vld [vmem:[#allocation3 + $0x304] ss:$16 sps:$4 sm:$0xff]   ;;  %v2991_v5 = vld [vmem:[#allocation3 + $0x300] ss:$16 sps:$4 sm:$0xff]   ;;  %v3019_v31 = vld [vmem:[#allocation3 + $0x268] ss:$16 sps:$4 sm:$0xff]  }
  0x3c   :  { %909 = vmatprep.subr.bf16.mxu1 %v2946_v33  ;;  %v48_v6 = vld [vmem:[%s3586_s0] sm:$0xff]  ;;  %v50_v8 = vld [vmem:[%s3586_s0 + $0x10] sm:$0xff]  ;;  %v3024_v32 = vld [vmem:[#allocation3 + $0x4c] ss:$16 sps:$4 sm:$0xff]  }
  0x3d   :  { %v52_v7 = vld [vmem:[%s3586_s0 + $0x20] sm:$0xff]  ;;  %v54_v9 = vld [vmem:[%s3586_s0 + $0x30] sm:$0xff]  ;;  %v3027_v33 = vld [vmem:[#allocation3 + $0x24c] ss:$16 sps:$4 sm:$0xff]  }
  0x3e   :  { %867 = vmatpush2.bf16.msra.mxu0 %v2948_v34  ;;  %v3486_v12 = vpack.c.bf16 %v52_v7, %v48_v6  ;;  %v3488_v13 = vpack.c.bf16 %v54_v9, %v50_v8  ;;  %v3022_v34 = vld [vmem:[#allocation3 + $0x48] ss:$16 sps:$4 sm:$0xff]   ;;  %v3084_v8 = vld [vmem:[#allocation3 + $0x10c] ss:$16 sps:$4 sm:$0xff]  }
  0x3f   :  { %910 = vmatpush2.bf16.msra.mxu1 %v2949_v35  ;;  %868 = vmatprep.subr.bf16.mxu0 %v2950_v36  ;;  %v3025_v35 = vld [vmem:[#allocation3 + $0x248] ss:$16 sps:$4 sm:$0xff]   ;;  %v3030_v36 = vld [vmem:[#allocation3 + $0x2c] ss:$16 sps:$4 sm:$0xff]  }
  0x40   :  { %911 = vmatprep.subr.bf16.mxu1 %v2952_v37  ;;  %v3033_v37 = vld [vmem:[#allocation3 + $0x22c] ss:$16 sps:$4 sm:$0xff]   ;;  %v3076_v6 = vld [vmem:[#allocation3 + $0x128] ss:$16 sps:$4 sm:$0xff]  }
  0x41   :  { %v3079_v7 = vld [vmem:[#allocation3 + $0x328] ss:$16 sps:$4 sm:$0xff]   ;;  %v3087_v9 = vld [vmem:[#allocation3 + $0x30c] ss:$16 sps:$4 sm:$0xff]  }
  0x42   :  { %869 = vmatpush2.bf16.msra.mxu0 %v2954_v38  ;;  %v3028_v38 = vld [vmem:[#allocation3 + $0x28] ss:$16 sps:$4 sm:$0xff]  }
  0x43   :  { %912 = vmatpush2.bf16.msra.mxu1 %v2955_v39  ;;  %870 = vmatprep.subr.bf16.mxu0 %v2956_v40  ;;  %v3031_v39 = vld [vmem:[#allocation3 + $0x228] ss:$16 sps:$4 sm:$0xff]   ;;  %v3036_v40 = vld [vmem:[#allocation3 + $0xc] ss:$16 sps:$4 sm:$0xff]  }
  0x44   :  { %913 = vmatprep.subr.bf16.mxu1 %v2958_v41  ;;  %v3039_v41 = vld [vmem:[#allocation3 + $0x20c] ss:$16 sps:$4 sm:$0xff]  }
  0x46   :  { %871 = vmatpush2.bf16.msra.mxu0 %v2960_v42  ;;  %v3034_v42 = vld [vmem:[#allocation3 + $0x8] ss:$16 sps:$4 sm:$0xff]  }
  0x47   :  { %914 = vmatpush2.bf16.msra.mxu1 %v2961_v43  ;;  %872 = vmatprep.subr.bf16.mxu0 %v2962_v44  ;;  %v3037_v43 = vld [vmem:[#allocation3 + $0x208] ss:$16 sps:$4 sm:$0xff]   ;;  %v3042_v44 = vld [vmem:[#allocation3 + $0x1ec] ss:$16 sps:$4 sm:$0xff]  }
  0x48   :  { %915 = vmatprep.subr.bf16.mxu1 %v2964_v45  ;;  %v3045_v45 = vld [vmem:[#allocation3 + $0x3ec] ss:$16 sps:$4 sm:$0xff]  }
  0x4a   :  { %873 = vmatpush2.bf16.msra.mxu0 %v2966_v50  ;;  %v3046_v50 = vld [vmem:[#allocation3 + $0x1c8] ss:$16 sps:$4 sm:$0xff]  }
  0x4b   :  { %916 = vmatpush2.bf16.msra.mxu1 %v2967_v51  ;;  %874 = vmatprep.subr.bf16.mxu0 %v2968_v52  ;;  %v3049_v51 = vld [vmem:[#allocation3 + $0x3c8] ss:$16 sps:$4 sm:$0xff]   ;;  %v3054_v52 = vld [vmem:[#allocation3 + $0x1ac] ss:$16 sps:$4 sm:$0xff]  }
  0x4c   :  { %917 = vmatprep.subr.bf16.mxu1 %v2970_v55  ;;  %v3055_v55 = vld [vmem:[#allocation3 + $0x3a8] ss:$16 sps:$4 sm:$0xff]  }
  0x4e   :  { %875 = vmatpush2.bf16.msra.mxu0 %v2972_v56  ;;  %v3060_v56 = vld [vmem:[#allocation3 + $0x18c] ss:$16 sps:$4 sm:$0xff]  }
  0x4f   :  { %918 = vmatpush2.bf16.msra.mxu1 %v2973_v57  ;;  %876 = vmatprep.subr.bf16.mxu0 %v2974_v58  ;;  %v3063_v57 = vld [vmem:[#allocation3 + $0x38c] ss:$16 sps:$4 sm:$0xff]   ;;  %v3058_v58 = vld [vmem:[#allocation3 + $0x188] ss:$16 sps:$4 sm:$0xff]  }
  0x50   :  { %919 = vmatprep.subr.bf16.mxu1 %v2976_v59  ;;  %v3061_v59 = vld [vmem:[#allocation3 + $0x388] ss:$16 sps:$4 sm:$0xff]  }
  0x52   :  { %877 = vmatpush2.bf16.msra.mxu0 %v2978_v60  ;;  %v3066_v60 = vld [vmem:[#allocation3 + $0x16c] ss:$16 sps:$4 sm:$0xff]  }
  0x53   :  { %920 = vmatpush2.bf16.msra.mxu1 %v2979_v61  ;;  %878 = vmatprep.subr.bf16.mxu0 %v2980_v62  ;;  %v3069_v61 = vld [vmem:[#allocation3 + $0x36c] ss:$16 sps:$4 sm:$0xff]   ;;  %v3064_v62 = vld [vmem:[#allocation3 + $0x168] ss:$16 sps:$4 sm:$0xff]  }
  0x54   :  { %921 = vmatprep.subr.bf16.mxu1 %v2982_v63  ;;  %v3067_v63 = vld [vmem:[#allocation3 + $0x368] ss:$16 sps:$4 sm:$0xff]  }
  0x56   :  { %879 = vmatpush2.bf16.msra.mxu0 %v2984_v0  ;;  %v3072_v0 = vld [vmem:[#allocation3 + $0x14c] ss:$16 sps:$4 sm:$0xff]  }
  0x57   :  { %922 = vmatpush2.bf16.msra.mxu1 %v2985_v1  ;;  %880 = vmatprep.subr.bf16.mxu0 %v2986_v2  ;;  %v3075_v1 = vld [vmem:[#allocation3 + $0x34c] ss:$16 sps:$4 sm:$0xff]   ;;  %v3070_v2 = vld [vmem:[#allocation3 + $0x148] ss:$16 sps:$4 sm:$0xff]  }
  0x58   :  { %923 = vmatprep.subr.bf16.mxu1 %v2988_v3  ;;  %v3073_v3 = vld [vmem:[#allocation3 + $0x348] ss:$16 sps:$4 sm:$0xff]  }
  0x5a   :  { %881 = vmatpush2.bf16.msra.mxu0 %v2990_v4  ;;  %v3078_v4 = vld [vmem:[#allocation3 + $0x12c] ss:$16 sps:$4 sm:$0xff]  }
  0x5b   :  { %924 = vmatpush2.bf16.msra.mxu1 %v2991_v5  ;;  %936 = vmatprep.subr.bf16.mxu0 %v2994_v10  ;;  %v3081_v5 = vld [vmem:[#allocation3 + $0x32c] ss:$16 sps:$4 sm:$0xff]   ;;  %v3082_v10 = vld [vmem:[#allocation3 + $0x108] ss:$16 sps:$4 sm:$0xff]  }
  0x5c   :  { %979 = vmatprep.subr.bf16.mxu1 %v2997_v11  ;;  %v3085_v11 = vld [vmem:[#allocation3 + $0x308] ss:$16 sps:$4 sm:$0xff]  }
  0x5d   :  { %883 = vmatmul.mubr.bf16.vlgmr.msra.gmra.mxu0 %v3486_v12 }
  0x5e   :  { %926 = vmatmul.mubr.bf16.vlgmr.msra.gmra.mxu1 %v3488_v13  ;;  %937 = vmatpush1.bf16.msra.mxu0 %v2992_v14  ;;  %v3090_v14 = vld [vmem:[#allocation5 + $0x154] ss:$24 sps:$4 sm:$0xff]  }
  0x5f   :  { %980 = vmatpush1.bf16.msra.mxu1 %v2995_v15  ;;  %938 = vmatprep.subr.bf16.mxu0 %v3000_v16  ;;  %v3088_v15 = vld [vmem:[#allocation5 + $0x150] ss:$24 sps:$4 sm:$0xff]   ;;  %v3093_v16 = vld [vmem:[#allocation5 + $0x124] ss:$24 sps:$4 sm:$0xff]  }
  0x60   :  { %981 = vmatprep.subr.bf16.mxu1 %v3003_v17  ;;  %968 = vmatprep.mubr.bf16.mxu0 %v57_v53  ;;  %v3057_v53 = vld [vmem:[#allocation3 + $0x3ac] ss:$16 sps:$4 sm:$0xff]   ;;  %v3091_v17 = vld [vmem:[#allocation5 + $0x120] ss:$24 sps:$4 sm:$0xff]  }
  0x61   :  { %1011 = vmatprep.mubr.bf16.mxu1 %v59_v54  ;;  %v3052_v54 = vld [vmem:[#allocation3 + $0x1a8] ss:$16 sps:$4 sm:$0xff]  }
  0x62   :  { %939 = vmatpush1.bf16.msra.mxu0 %v2998_v18  ;;  %v3096_v18 = vld [vmem:[#allocation5 + $0xf4] ss:$24 sps:$4 sm:$0xff]  }
  0x63   :  { %982 = vmatpush1.bf16.msra.mxu1 %v3001_v19  ;;  %940 = vmatprep.subr.bf16.mxu0 %v3006_v20  ;;  %v3094_v19 = vld [vmem:[#allocation5 + $0xf0] ss:$24 sps:$4 sm:$0xff]   ;;  %v3099_v20 = vld [vmem:[#allocation5 + $0xc4] ss:$24 sps:$4 sm:$0xff]  }
  0x64   :  { %983 = vmatprep.subr.bf16.mxu1 %v3009_v21  ;;  %v3097_v21 = vld [vmem:[#allocation5 + $0xc0] ss:$24 sps:$4 sm:$0xff]  }
  0x66   :  { %941 = vmatpush1.bf16.msra.mxu0 %v3004_v22  ;;  %v3102_v22 = vld [vmem:[#allocation5 + $0x94] ss:$24 sps:$4 sm:$0xff]  }
  0x67   :  { %984 = vmatpush1.bf16.msra.mxu1 %v3007_v23  ;;  %942 = vmatprep.subr.bf16.mxu0 %v3012_v24  ;;  %v3100_v23 = vld [vmem:[#allocation5 + $0x90] ss:$24 sps:$4 sm:$0xff]   ;;  %v3138_v24 = vld [vmem:[#allocation5 + $0x454] ss:$24 sps:$4 sm:$0xff]  }
  0x68   :  { %985 = vmatprep.subr.bf16.mxu1 %v3015_v25  ;;  %v3105_v25 = vld [vmem:[#allocation5 + $0x64] ss:$24 sps:$4 sm:$0xff]  }
  0x6a   :  { %943 = vmatpush1.bf16.msra.mxu0 %v3010_v26  ;;  %v3142_v26 = vld [vmem:[#allocation5 + $0x420] ss:$24 sps:$4 sm:$0xff]  }
  0x6b   :  { %986 = vmatpush1.bf16.msra.mxu1 %v3013_v27  ;;  %944 = vmatprep.subr.bf16.mxu0 %v3018_v28  ;;  %v3144_v27 = vld [vmem:[#allocation5 + $0x424] ss:$24 sps:$4 sm:$0xff]   ;;  %v3108_v28 = vld [vmem:[#allocation5 + $0x34] ss:$24 sps:$4 sm:$0xff]  }
  0x6c   :  { %987 = vmatprep.subr.bf16.mxu1 %v3021_v29  ;;  %v3106_v29 = vld [vmem:[#allocation5 + $0x30] ss:$24 sps:$4 sm:$0xff]  }
  0x6e   :  { %945 = vmatpush1.bf16.msra.mxu0 %v3016_v30  ;;  %v3148_v30 = vld [vmem:[#allocation5 + $0x3f0] ss:$24 sps:$4 sm:$0xff]  }
  0x6f   :  { %988 = vmatpush1.bf16.msra.mxu1 %v3019_v31  ;;  %946 = vmatprep.subr.bf16.mxu0 %v3024_v32  ;;  %v3150_v31 = vld [vmem:[#allocation5 + $0x3f4] ss:$24 sps:$4 sm:$0xff]   ;;  %v3111_v32 = vld [vmem:[#allocation5 + $0x4] ss:$24 sps:$4 sm:$0xff]  }
  0x70   :  { %989 = vmatprep.subr.bf16.mxu1 %v3027_v33  ;;  %v3109_v33 = vld [vmem:[#allocation5] ss:$24 sps:$4 sm:$0xff]  }
  0x72   :  { %947 = vmatpush1.bf16.msra.mxu0 %v3022_v34  ;;  %v3154_v34 = vld [vmem:[#allocation5 + $0x3c0] ss:$24 sps:$4 sm:$0xff]  }
  0x73   :  { %990 = vmatpush1.bf16.msra.mxu1 %v3025_v35  ;;  %948 = vmatprep.subr.bf16.mxu0 %v3030_v36  ;;  %v3156_v35 = vld [vmem:[#allocation5 + $0x3c4] ss:$24 sps:$4 sm:$0xff]   ;;  %v3114_v36 = vld [vmem:[#allocation5 + $0x2d4] ss:$24 sps:$4 sm:$0xff]  }
  0x74   :  { %991 = vmatprep.subr.bf16.mxu1 %v3033_v37  ;;  %v3112_v37 = vld [vmem:[#allocation5 + $0x2d0] ss:$24 sps:$4 sm:$0xff]  }
  0x76   :  { %949 = vmatpush1.bf16.msra.mxu0 %v3028_v38  ;;  %v3160_v38 = vld [vmem:[#allocation5 + $0x390] ss:$24 sps:$4 sm:$0xff]  }
  0x77   :  { %992 = vmatpush1.bf16.msra.mxu1 %v3031_v39  ;;  %950 = vmatprep.subr.bf16.mxu0 %v3036_v40  ;;  %v3162_v39 = vld [vmem:[#allocation5 + $0x394] ss:$24 sps:$4 sm:$0xff]   ;;  %v3117_v40 = vld [vmem:[#allocation5 + $0x2a4] ss:$24 sps:$4 sm:$0xff]  }
  0x78   :  { %993 = vmatprep.subr.bf16.mxu1 %v3039_v41  ;;  %v3115_v41 = vld [vmem:[#allocation5 + $0x2a0] ss:$24 sps:$4 sm:$0xff]  }
  0x7a   :  { %951 = vmatpush1.bf16.msra.mxu0 %v3034_v42  ;;  %v3166_v42 = vld [vmem:[#allocation5 + $0x360] ss:$24 sps:$4 sm:$0xff]  }
  0x7b   :  { %994 = vmatpush1.bf16.msra.mxu1 %v3037_v43  ;;  %952 = vmatprep.subr.bf16.mxu0 %v3042_v44  ;;  %v3168_v43 = vld [vmem:[#allocation5 + $0x364] ss:$24 sps:$4 sm:$0xff]   ;;  %v3120_v44 = vld [vmem:[#allocation5 + $0x274] ss:$24 sps:$4 sm:$0xff]  }
  0x7c   :  { %995 = vmatprep.subr.bf16.mxu1 %v3045_v45  ;;  %v3118_v45 = vld [vmem:[#allocation5 + $0x270] ss:$24 sps:$4 sm:$0xff]  }
  0x7e   :  { %953 = vmatpush2.bf16.msra.mxu0 %v3040_v46  ;;  %v3172_v46 = vld [vmem:[#allocation5 + $0x330] ss:$24 sps:$4 sm:$0xff]  }
  0x7f   :  { %996 = vmatpush2.bf16.msra.mxu1 %v3043_v47  ;;  %954 = vmatprep.subr.bf16.mxu0 %v3048_v48  ;;  %v3174_v47 = vld [vmem:[#allocation5 + $0x334] ss:$24 sps:$4 sm:$0xff]   ;;  %v3123_v48 = vld [vmem:[#allocation5 + $0x244] ss:$24 sps:$4 sm:$0xff]  }
  0x80   :  { %997 = vmatprep.subr.bf16.mxu1 %v3051_v49  ;;  %v3121_v49 = vld [vmem:[#allocation5 + $0x240] ss:$24 sps:$4 sm:$0xff]  }
  0x82   :  { %955 = vmatpush2.bf16.msra.mxu0 %v3046_v50  ;;  %v3178_v50 = vld [vmem:[#allocation5 + $0x300] ss:$24 sps:$4 sm:$0xff]  }
  0x83   :  { %998 = vmatpush2.bf16.msra.mxu1 %v3049_v51  ;;  %956 = vmatprep.subr.bf16.mxu0 %v3054_v52  ;;  %v3180_v51 = vld [vmem:[#allocation5 + $0x304] ss:$24 sps:$4 sm:$0xff]   ;;  %v3126_v52 = vld [vmem:[#allocation5 + $0x214] ss:$24 sps:$4 sm:$0xff]  }
  0x84   :  { %999 = vmatprep.subr.bf16.mxu1 %v3057_v53  ;;  %v3124_v53 = vld [vmem:[#allocation5 + $0x210] ss:$24 sps:$4 sm:$0xff]  }
  0x86   :  { %957 = vmatpush2.bf16.msra.mxu0 %v3052_v54  ;;  %v3184_v54 = vld [vmem:[#allocation5 + $0x5d0] ss:$24 sps:$4 sm:$0xff]  }
  0x87   :  { %1000 = vmatpush2.bf16.msra.mxu1 %v3055_v55  ;;  %958 = vmatprep.subr.bf16.mxu0 %v3060_v56  ;;  %v3186_v55 = vld [vmem:[#allocation5 + $0x5d4] ss:$24 sps:$4 sm:$0xff]   ;;  %v3129_v56 = vld [vmem:[#allocation5 + $0x1e4] ss:$24 sps:$4 sm:$0xff]  }
  0x88   :  { %1001 = vmatprep.subr.bf16.mxu1 %v3063_v57  ;;  %v3127_v57 = vld [vmem:[#allocation5 + $0x1e0] ss:$24 sps:$4 sm:$0xff]  }
  0x8a   :  { %959 = vmatpush2.bf16.msra.mxu0 %v3058_v58  ;;  %v3190_v58 = vld [vmem:[#allocation5 + $0x5a0] ss:$24 sps:$4 sm:$0xff]  }
  0x8b   :  { %1002 = vmatpush2.bf16.msra.mxu1 %v3061_v59  ;;  %960 = vmatprep.subr.bf16.mxu0 %v3066_v60  ;;  %v3192_v59 = vld [vmem:[#allocation5 + $0x5a4] ss:$24 sps:$4 sm:$0xff]   ;;  %v3132_v60 = vld [vmem:[#allocation5 + $0x1b4] ss:$24 sps:$4 sm:$0xff]  }
  0x8c   :  { %1003 = vmatprep.subr.bf16.mxu1 %v3069_v61  ;;  %v3130_v61 = vld [vmem:[#allocation5 + $0x1b0] ss:$24 sps:$4 sm:$0xff]  }
  0x8e   :  { %961 = vmatpush2.bf16.msra.mxu0 %v3064_v62  ;;  %v3196_v62 = vld [vmem:[#allocation5 + $0x570] ss:$24 sps:$4 sm:$0xff]  }
  0x8f   :  { %1004 = vmatpush2.bf16.msra.mxu1 %v3067_v63  ;;  %962 = vmatprep.subr.bf16.mxu0 %v3072_v0  ;;  %v3198_v63 = vld [vmem:[#allocation5 + $0x574] ss:$24 sps:$4 sm:$0xff]   ;;  %v3135_v0 = vld [vmem:[#allocation5 + $0x184] ss:$24 sps:$4 sm:$0xff]  }
  0x90   :  { %1005 = vmatprep.subr.bf16.mxu1 %v3075_v1  ;;  %v3133_v1 = vld [vmem:[#allocation5 + $0x180] ss:$24 sps:$4 sm:$0xff]  }
  0x92   :  { %963 = vmatpush2.bf16.msra.mxu0 %v3070_v2  ;;  %v3202_v2 = vld [vmem:[#allocation5 + $0x540] ss:$24 sps:$4 sm:$0xff]  }
  0x93   :  { %1006 = vmatpush2.bf16.msra.mxu1 %v3073_v3  ;;  %964 = vmatprep.subr.bf16.mxu0 %v3078_v4  ;;  %v3204_v3 = vld [vmem:[#allocation5 + $0x544] ss:$24 sps:$4 sm:$0xff]  }
  0x94   :  { %1007 = vmatprep.subr.bf16.mxu1 %v3081_v5  ;;  %v3141_v4 = vld [vmem:[#allocation5 + $0x15c] ss:$24 sps:$4 sm:$0xff]   ;;  %v3208_v5 = vld [vmem:[#allocation5 + $0x510] ss:$24 sps:$4 sm:$0xff]  }
  0x96   :  { %965 = vmatpush2.bf16.msra.mxu0 %v3076_v6  ;;  %v3210_v6 = vld [vmem:[#allocation5 + $0x514] ss:$24 sps:$4 sm:$0xff]  }
  0x97   :  { %1008 = vmatpush2.bf16.msra.mxu1 %v3079_v7  ;;  %966 = vmatprep.subr.bf16.mxu0 %v3084_v8  ;;  %v3216_v7 = vld [vmem:[#allocation5 + $0x4e4] ss:$24 sps:$4 sm:$0xff]   ;;  %v3214_v8 = vld [vmem:[#allocation5 + $0x4e0] ss:$24 sps:$4 sm:$0xff]  }
  0x98   :  { %1009 = vmatprep.subr.bf16.mxu1 %v3087_v9  ;;  %v3222_v9 = vld [vmem:[#allocation5 + $0x4b4] ss:$24 sps:$4 sm:$0xff]  }
  0x9a   :  { %967 = vmatpush2.bf16.msra.mxu0 %v3082_v10  ;;  %v3220_v10 = vld [vmem:[#allocation5 + $0x4b0] ss:$24 sps:$4 sm:$0xff]  }
  0x9b   :  { %1010 = vmatpush2.bf16.msra.mxu1 %v3085_v11  ;;  %2266 = vmatprep.subr.bf16.mxu0 %v3090_v14  ;;  %v3228_v11 = vld [vmem:[#allocation5 + $0x484] ss:$24 sps:$4 sm:$0xff]   ;;  %v3226_v14 = vld [vmem:[#allocation5 + $0x480] ss:$24 sps:$4 sm:$0xff]  }
  0x9c   :  { %2309 = vmatprep.subr.bf16.mxu1 %v3138_v24 }
  0x9d   :  { %969 = vmatmul.mubr.bf16.vlgmr.msra.gmra.mxu0 %v3486_v12  ;;  %v3136_v12 = vld [vmem:[#allocation5 + $0x450] ss:$24 sps:$4 sm:$0xff]  }
  0x9e   :  { %1012 = vmatmul.mubr.bf16.vlgmr.msra.gmra.mxu1 %v3488_v13  ;;  %2267 = vmatpush1.bf16.msra.mxu0 %v3088_v15  ;;  %v3103_v13 = vld [vmem:[#allocation5 + $0x60] ss:$24 sps:$4 sm:$0xff]   ;;  %v3234_v15 = vld [vmem:[#allocation5 + $0x45c] ss:$24 sps:$4 sm:$0xff]  }
  0x9f   :  { %2268 = vmatprep.subr.bf16.mxu0 %v3093_v16  ;;  %2310 = vmatpush1.bf16.msra.mxu1 %v3136_v12  ;;  %v190_v16 = vlaneseq }
  0xa0   :  { %2311 = vmatprep.subr.bf16.mxu1 %v3144_v27 }
  0xa2   :  { %2269 = vmatpush1.bf16.msra.mxu0 %v3091_v17  ;;  %v3494_v17 = vshrl.u32 %v190_v16, 7  ;;  %v3225_v16 = vld [vmem:[#allocation5 + $0x1bc] ss:$24 sps:$4 sm:$0xff]  }
  0xa3   :  { %2270 = vmatprep.subr.bf16.mxu0 %v3096_v18  ;;  %2312 = vmatpush1.bf16.msra.mxu1 %v3142_v26 }
  0xa4   :  { %2313 = vmatprep.subr.bf16.mxu1 %v3150_v31  ;;  %v196_v18 = vsub.s32 1, %v3494_v17 }
  0xa6   :  { %2271 = vmatpush1.bf16.msra.mxu0 %v3094_v19  ;;  %v3500_v19 = vld [vmem:[%s3588_s2] sm:$0xf] }
  0xa7   :  { %2272 = vmatprep.subr.bf16.mxu0 %v3099_v20  ;;  %2314 = vmatpush1.bf16.msra.mxu1 %v3148_v30  ;;  %v192_v20 = vsub.s32 0, %v3494_v17 }
  0xa8   :  { %2315 = vmatprep.subr.bf16.mxu1 %v3156_v35 }
  0xaa   :  { %2273 = vmatpush1.bf16.msra.mxu0 %v3097_v21  ;;  %v197_v21 = vrot.slane %v3500_v19, %v196_v18 }
  0xab   :  { %2274 = vmatprep.subr.bf16.mxu0 %v3102_v22  ;;  %2316 = vmatpush1.bf16.msra.mxu1 %v3154_v34  ;;  %v193_v22 = vrot.slane %v3500_v19, %v192_v20 }
  0xac   :  { %2317 = vmatprep.subr.bf16.mxu1 %v3162_v39 }
  0xae   :  { %2275 = vmatpush1.bf16.msra.mxu0 %v3100_v23 }
  0xaf   :  { %2276 = vmatprep.subr.bf16.mxu0 %v3105_v25  ;;  %2318 = vmatpush1.bf16.msra.mxu1 %v3160_v38 }
  0xb0   :  { %2319 = vmatprep.subr.bf16.mxu1 %v3168_v43 }
  0xb2   :  { %2277 = vmatpush1.bf16.msra.mxu0 %v3103_v13 }
  0xb3   :  { %2278 = vmatprep.subr.bf16.mxu0 %v3108_v28  ;;  %2320 = vmatpush1.bf16.msra.mxu1 %v3166_v42  ;;  %v3139_v42 = vld [vmem:[#allocation5 + $0x158] ss:$24 sps:$4 sm:$0xff]  }
  0xb4   :  { %2321 = vmatprep.subr.bf16.mxu1 %v3174_v47  ;;  %v3151_v47 = vld [vmem:[#allocation5 + $0xf8] ss:$24 sps:$4 sm:$0xff]  }
  0xb6   :  { %2279 = vmatpush1.bf16.msra.mxu0 %v3106_v29 }
  0xb7   :  { %2280 = vmatprep.subr.bf16.mxu0 %v3111_v32  ;;  %2322 = vmatpush1.bf16.msra.mxu1 %v3172_v46  ;;  %v3153_v46 = vld [vmem:[#allocation5 + $0xfc] ss:$24 sps:$4 sm:$0xff]  }
  0xb8   :  { %2323 = vmatprep.subr.bf16.mxu1 %v3180_v51  ;;  %v3163_v51 = vld [vmem:[#allocation5 + $0x98] ss:$24 sps:$4 sm:$0xff]  }
  0xba   :  { %2281 = vmatpush1.bf16.msra.mxu0 %v3109_v33 }
  0xbb   :  { %2282 = vmatprep.subr.bf16.mxu0 %v3114_v36  ;;  %2324 = vmatpush1.bf16.msra.mxu1 %v3178_v50  ;;  %v3165_v50 = vld [vmem:[#allocation5 + $0x9c] ss:$24 sps:$4 sm:$0xff]  }
  0xbc   :  { %2325 = vmatprep.subr.bf16.mxu1 %v3186_v55  ;;  %v3175_v55 = vld [vmem:[#allocation5 + $0x38] ss:$24 sps:$4 sm:$0xff]  }
  0xbe   :  { %2283 = vmatpush2.bf16.msra.mxu0 %v3112_v37 }
  0xbf   :  { %2284 = vmatprep.subr.bf16.mxu0 %v3117_v40  ;;  %2326 = vmatpush2.bf16.msra.mxu1 %v3184_v54  ;;  %v3177_v54 = vld [vmem:[#allocation5 + $0x3c] ss:$24 sps:$4 sm:$0xff]  }
  0xc0   :  { %2327 = vmatprep.subr.bf16.mxu1 %v3192_v59  ;;  %v3187_v59 = vld [vmem:[#allocation5 + $0x2d8] ss:$24 sps:$4 sm:$0xff]  }
  0xc2   :  { %2285 = vmatpush2.bf16.msra.mxu0 %v3115_v41 }
  0xc3   :  { %2286 = vmatprep.subr.bf16.mxu0 %v3120_v44  ;;  %2328 = vmatpush2.bf16.msra.mxu1 %v3190_v58  ;;  %v3147_v44 = vld [vmem:[#allocation5 + $0x12c] ss:$24 sps:$4 sm:$0xff]   ;;  %v3189_v58 = vld [vmem:[#allocation5 + $0x2dc] ss:$24 sps:$4 sm:$0xff]  }
  0xc4   :  { %2329 = vmatprep.subr.bf16.mxu1 %v3198_v63  ;;  %v3199_v63 = vld [vmem:[#allocation5 + $0x278] ss:$24 sps:$4 sm:$0xff]  }
  0xc6   :  { %2287 = vmatpush2.bf16.msra.mxu0 %v3118_v45  ;;  %v3145_v45 = vld [vmem:[#allocation5 + $0x128] ss:$24 sps:$4 sm:$0xff]  }
  0xc7   :  { %2288 = vmatprep.subr.bf16.mxu0 %v3123_v48  ;;  %2330 = vmatpush2.bf16.msra.mxu1 %v3196_v62  ;;  %v3159_v48 = vld [vmem:[#allocation5 + $0xcc] ss:$24 sps:$4 sm:$0xff]   ;;  %v3201_v62 = vld [vmem:[#allocation5 + $0x27c] ss:$24 sps:$4 sm:$0xff]  }
  0xc8   :  { %2331 = vmatprep.subr.bf16.mxu1 %v3204_v3  ;;  %v204_v3 = vsub.s32 3, %v3494_v17 }
  0xca   :  { %2289 = vmatpush2.bf16.msra.mxu0 %v3121_v49  ;;  %v3157_v49 = vld [vmem:[#allocation5 + $0xc8] ss:$24 sps:$4 sm:$0xff]  }
  0xcb   :  { %2290 = vmatprep.subr.bf16.mxu0 %v3126_v52  ;;  %2332 = vmatpush2.bf16.msra.mxu1 %v3202_v2  ;;  %v3171_v52 = vld [vmem:[#allocation5 + $0x6c] ss:$24 sps:$4 sm:$0xff]   ;;  %v3213_v2 = vld [vmem:[#allocation5 + $0x21c] ss:$24 sps:$4 sm:$0xff]  }
  0xcc   :  { %2333 = vmatprep.subr.bf16.mxu1 %v3210_v6  ;;  %v3219_v6 = vld [vmem:[#allocation5 + $0x1ec] ss:$24 sps:$4 sm:$0xff]  }
  0xce   :  { %2291 = vmatpush2.bf16.msra.mxu0 %v3124_v53  ;;  %v3169_v53 = vld [vmem:[#allocation5 + $0x68] ss:$24 sps:$4 sm:$0xff]  }
  0xcf   :  { %2292 = vmatprep.subr.bf16.mxu0 %v3129_v56  ;;  %2334 = vmatpush2.bf16.msra.mxu1 %v3208_v5  ;;  %v3183_v56 = vld [vmem:[#allocation5 + $0xc] ss:$24 sps:$4 sm:$0xff]   ;;  %v3211_v5 = vld [vmem:[#allocation5 + $0x218] ss:$24 sps:$4 sm:$0xff]  }
  0xd0   :  { %2335 = vmatprep.subr.bf16.mxu1 %v3216_v7  ;;  %v205_v7 = vrot.slane %v3500_v19, %v204_v3 }
  0xd2   :  { %2293 = vmatpush2.bf16.msra.mxu0 %v3127_v57  ;;  %v3181_v57 = vld [vmem:[#allocation5 + $0x8] ss:$24 sps:$4 sm:$0xff]  }
  0xd3   :  { %2294 = vmatprep.subr.bf16.mxu0 %v3132_v60  ;;  %2336 = vmatpush2.bf16.msra.mxu1 %v3214_v8  ;;  %v3195_v60 = vld [vmem:[#allocation5 + $0x2ac] ss:$24 sps:$4 sm:$0xff]  }
  0xd4   :  { %2337 = vmatprep.subr.bf16.mxu1 %v3222_v9 }
  0xd6   :  { %2295 = vmatpush2.bf16.msra.mxu0 %v3130_v61  ;;  %v3193_v61 = vld [vmem:[#allocation5 + $0x2a8] ss:$24 sps:$4 sm:$0xff]  }
  0xd7   :  { %2296 = vmatprep.subr.bf16.mxu0 %v3135_v0  ;;  %2338 = vmatpush2.bf16.msra.mxu1 %v3220_v10  ;;  %v3207_v0 = vld [vmem:[#allocation5 + $0x24c] ss:$24 sps:$4 sm:$0xff]  }
  0xd8   :  { %2339 = vmatprep.subr.bf16.mxu1 %v3228_v11  ;;  %v3217_v11 = vld [vmem:[#allocation5 + $0x1e8] ss:$24 sps:$4 sm:$0xff]  }
  0xda   :  { %2297 = vmatpush2.bf16.msra.mxu0 %v3133_v1  ;;  %v3205_v1 = vld [vmem:[#allocation5 + $0x248] ss:$24 sps:$4 sm:$0xff]  }
  0xdb   :  { %2352 = vmatprep.subr.bf16.mxu0 %v3141_v4  ;;  %2340 = vmatpush2.bf16.msra.mxu1 %v3226_v14  ;;  %v200_v4 = vsub.s32 2, %v3494_v17 }
  0xdc   :  { %2395 = vmatprep.subr.bf16.mxu1 %v3234_v15 }
  0xdd   :  { %v201_v8 = vrot.slane %v3500_v19, %v200_v4 }
 0x11d   :  { %v884_v23 = vpop.f32.mrf.mxu0 }
 0x11e   :  { %v927_v24 = vpop.f32.mrf.mxu1  ;;  %v885_v26 = vadd.f32 %v884_v23, %v193_v22 }
 0x11f   :  { %v886_v25 = vpop.f32.mrf.mxu0 }
 0x120   :  { %v929_v12 = vpop.f32.mrf.mxu1  ;;  %v887_v13 = vadd.f32 %v886_v25, %v197_v21  ;;  %v928_v34 = vadd.f32 %v927_v24, %v885_v26  ;;  %v3231_v26 = vld [vmem:[#allocation5 + $0x18c] ss:$24 sps:$4 sm:$0xff]  }
 0x121   :  { %v888_v27 = vpop.f32.mrf.mxu0 }
 0x122   :  { %v931_v28 = vpop.f32.mrf.mxu1  ;;  %v889_v29 = vadd.f32 %v888_v27, %v193_v22  ;;  %v930_v31 = vadd.f32 %v929_v12, %v887_v13  ;;  %v1022_v40 = vmax.f32 %v928_v34, 0.0  ;;  %v3223_v12 = vld [vmem:[#allocation5 + $0x1b8] ss:$24 sps:$4 sm:$0xff]   ;;  %v3237_v34 = vld [vmem:[#allocation5 + $0x164] ss:$24 sps:$4 sm:$0xff]  }
 0x123   :  { %v890_v30 = vpop.f32.mrf.mxu0 }
 0x124   :  { %v932_v32 = vadd.f32 %v931_v28, %v889_v29  ;;  %v891_v33 = vadd.f32 %v890_v30, %v197_v21  ;;  %v933_v35 = vpop.f32.mrf.mxu1  ;;  %v1023_v38 = vmax.f32 %v930_v31, 0.0 }
 0x126   :  { %v934_v36 = vadd.f32 %v933_v35, %v891_v33  ;;  %v1026_v37 = vmax.f32 %v932_v32, 0.0  ;;  %v3229_v32 = vld [vmem:[#allocation5 + $0x188] ss:$24 sps:$4 sm:$0xff]  }
 0x128   :  { %v1027_v39 = vmax.f32 %v934_v36, 0.0  ;;  %v3511_v43 = vpack.c.bf16 %v1026_v37, %v1022_v40  ;;  %v3235_v40 = vld [vmem:[#allocation5 + $0x160] ss:$24 sps:$4 sm:$0xff]  }
 0x12a   :  { %v3509_v41 = vpack.c.bf16 %v1027_v39, %v1023_v38  ;;  %v3232_v39 = vld [vmem:[#allocation5 + $0x458] ss:$24 sps:$4 sm:$0xff]  }
 0x12c   :  { %2298 = vmatprep.mubr.bf16.mxu0 %v3509_v41 }
 0x12d   :  { %2299 = vmatmul.mubr.bf16.vlgmr.msra.gmra.mxu0 %v3511_v43 }
 0x12e   :  { %2353 = vmatpush1.bf16.msra.mxu0 %v3139_v42  ;;  %2384 = vmatprep.mubr.bf16.mxu0 %v3509_v41 }
 0x12f   :  { %2354 = vmatprep.subr.bf16.mxu0 %v3147_v44  ;;  %v3240_v44 = vld [vmem:[#allocation5 + $0x42c] ss:$24 sps:$4 sm:$0xff]  }
 0x132   :  { %2355 = vmatpush1.bf16.msra.mxu0 %v3145_v45  ;;  %v3243_v45 = vld [vmem:[#allocation5 + $0x134] ss:$24 sps:$4 sm:$0xff]  }
 0x133   :  { %2356 = vmatprep.subr.bf16.mxu0 %v3153_v46  ;;  %v3238_v46 = vld [vmem:[#allocation5 + $0x428] ss:$24 sps:$4 sm:$0xff]  }
 0x136   :  { %2357 = vmatpush1.bf16.msra.mxu0 %v3151_v47  ;;  %v3241_v47 = vld [vmem:[#allocation5 + $0x130] ss:$24 sps:$4 sm:$0xff]  }
 0x137   :  { %2358 = vmatprep.subr.bf16.mxu0 %v3159_v48  ;;  %v3246_v48 = vld [vmem:[#allocation5 + $0x3fc] ss:$24 sps:$4 sm:$0xff]  }
 0x13a   :  { %2359 = vmatpush1.bf16.msra.mxu0 %v3157_v49  ;;  %v3249_v49 = vld [vmem:[#allocation5 + $0x104] ss:$24 sps:$4 sm:$0xff]  }
 0x13b   :  { %2360 = vmatprep.subr.bf16.mxu0 %v3165_v50  ;;  %v3244_v50 = vld [vmem:[#allocation5 + $0x3f8] ss:$24 sps:$4 sm:$0xff]  }
 0x13e   :  { %2361 = vmatpush1.bf16.msra.mxu0 %v3163_v51  ;;  %v3247_v51 = vld [vmem:[#allocation5 + $0x100] ss:$24 sps:$4 sm:$0xff]  }
 0x13f   :  { %2362 = vmatprep.subr.bf16.mxu0 %v3171_v52  ;;  %v3252_v52 = vld [vmem:[#allocation5 + $0x3cc] ss:$24 sps:$4 sm:$0xff]  }
 0x142   :  { %2363 = vmatpush1.bf16.msra.mxu0 %v3169_v53  ;;  %v3255_v53 = vld [vmem:[#allocation5 + $0xd4] ss:$24 sps:$4 sm:$0xff]  }
 0x143   :  { %2364 = vmatprep.subr.bf16.mxu0 %v3177_v54  ;;  %v3250_v54 = vld [vmem:[#allocation5 + $0x3c8] ss:$24 sps:$4 sm:$0xff]  }
 0x146   :  { %2365 = vmatpush1.bf16.msra.mxu0 %v3175_v55  ;;  %v3253_v55 = vld [vmem:[#allocation5 + $0xd0] ss:$24 sps:$4 sm:$0xff]  }
 0x147   :  { %2366 = vmatprep.subr.bf16.mxu0 %v3183_v56  ;;  %v3261_v56 = vld [vmem:[#allocation5 + $0xa4] ss:$24 sps:$4 sm:$0xff]  }
 0x14a   :  { %2367 = vmatpush1.bf16.msra.mxu0 %v3181_v57  ;;  %v3256_v57 = vld [vmem:[#allocation5 + $0x398] ss:$24 sps:$4 sm:$0xff]  }
 0x14b   :  { %2368 = vmatprep.subr.bf16.mxu0 %v3189_v58  ;;  %v3259_v58 = vld [vmem:[#allocation5 + $0xa0] ss:$24 sps:$4 sm:$0xff]  }
 0x14e   :  { %2369 = vmatpush2.bf16.msra.mxu0 %v3187_v59  ;;  %v3264_v59 = vld [vmem:[#allocation5 + $0x36c] ss:$24 sps:$4 sm:$0xff]  }
 0x14f   :  { %2370 = vmatprep.subr.bf16.mxu0 %v3195_v60  ;;  %v3267_v60 = vld [vmem:[#allocation5 + $0x74] ss:$24 sps:$4 sm:$0xff]  }
 0x152   :  { %2371 = vmatpush2.bf16.msra.mxu0 %v3193_v61  ;;  %v3262_v61 = vld [vmem:[#allocation5 + $0x368] ss:$24 sps:$4 sm:$0xff]  }
 0x153   :  { %2372 = vmatprep.subr.bf16.mxu0 %v3201_v62  ;;  %v3265_v62 = vld [vmem:[#allocation5 + $0x70] ss:$24 sps:$4 sm:$0xff]  }
 0x156   :  { %2373 = vmatpush2.bf16.msra.mxu0 %v3199_v63  ;;  %v3270_v63 = vld [vmem:[#allocation5 + $0x33c] ss:$24 sps:$4 sm:$0xff]  }
 0x157   :  { %2374 = vmatprep.subr.bf16.mxu0 %v3207_v0  ;;  %v3273_v0 = vld [vmem:[#allocation5 + $0x44] ss:$24 sps:$4 sm:$0xff]  }
 0x15a   :  { %2375 = vmatpush2.bf16.msra.mxu0 %v3205_v1  ;;  %v3268_v1 = vld [vmem:[#allocation5 + $0x338] ss:$24 sps:$4 sm:$0xff]  }
 0x15b   :  { %2376 = vmatprep.subr.bf16.mxu0 %v3213_v2  ;;  %v3271_v2 = vld [vmem:[#allocation5 + $0x40] ss:$24 sps:$4 sm:$0xff]  }
 0x15d   :  { %v970_v9 = vpop.f32.mrf.mxu0 }
 0x15e   :  { %v1013_v10 = vpop.f32.mrf.mxu1  ;;  %2377 = vmatpush2.bf16.msra.mxu0 %v3211_v5  ;;  %v971_v22 = vadd.f32 %v970_v9, %v201_v8  ;;  %v3276_v5 = vld [vmem:[#allocation5 + $0x30c] ss:$24 sps:$4 sm:$0xff]   ;;  %v3282_v9 = vld [vmem:[#allocation5 + $0x5dc] ss:$24 sps:$4 sm:$0xff]  }
 0x15f   :  { %v972_v14 = vpop.f32.mrf.mxu0  ;;  %2378 = vmatprep.subr.bf16.mxu0 %v3219_v6  ;;  %v3279_v6 = vld [vmem:[#allocation5 + $0x14] ss:$24 sps:$4 sm:$0xff]  }
 0x160   :  { %v1015_v15 = vpop.f32.mrf.mxu1  ;;  %v973_v21 = vadd.f32 %v972_v14, %v205_v7  ;;  %v1014_v29 = vadd.f32 %v1013_v10, %v971_v22  ;;  %v3285_v10 = vld [vmem:[#allocation5 + $0x2e4] ss:$24 sps:$4 sm:$0xff]   ;;  %v3283_v14 = vld [vmem:[#allocation5 + $0x2e0] ss:$24 sps:$4 sm:$0xff]   ;;  %v3289_v22 = vld [vmem:[#allocation5 + $0x2b0] ss:$24 sps:$4 sm:$0xff]  }
 0x161   :  { %v974_v23 = vpop.f32.mrf.mxu0 }
 0x162   :  { %v1017_v24 = vpop.f32.mrf.mxu1  ;;  %v975_v25 = vadd.f32 %v974_v23, %v201_v8  ;;  %2379 = vmatpush2.bf16.msra.mxu0 %v3217_v11  ;;  %v1016_v27 = vadd.f32 %v1015_v15, %v973_v21  ;;  %v1024_v37 = vmax.f32 %v1014_v29, 0.0  ;;  %v3277_v8 = vld [vmem:[#allocation5 + $0x10] ss:$24 sps:$4 sm:$0xff]   ;;  %v3288_v15 = vld [vmem:[#allocation5 + $0x5ac] ss:$24 sps:$4 sm:$0xff]  }
 0x163   :  { %v976_v13 = vpop.f32.mrf.mxu0  ;;  %2380 = vmatprep.subr.bf16.mxu0 %v3225_v16  ;;  %v3280_v11 = vld [vmem:[#allocation5 + $0x5d8] ss:$24 sps:$4 sm:$0xff]   ;;  %v3291_v16 = vld [vmem:[#allocation5 + $0x2b4] ss:$24 sps:$4 sm:$0xff]   ;;  %v3286_v21 = vld [vmem:[#allocation5 + $0x5a8] ss:$24 sps:$4 sm:$0xff]  }
 0x164   :  { %v1018_v19 = vadd.f32 %v1017_v24, %v975_v25  ;;  %v977_v28 = vadd.f32 %v976_v13, %v205_v7  ;;  %v1019_v30 = vpop.f32.mrf.mxu1  ;;  %v1025_v35 = vmax.f32 %v1016_v27, 0.0  ;;  %v3274_v7 = vld [vmem:[#allocation5 + $0x308] ss:$24 sps:$4 sm:$0xff]   ;;  %v3294_v23 = vld [vmem:[#allocation5 + $0x57c] ss:$24 sps:$4 sm:$0xff]  }
 0x165   :  { %v3297_v24 = vld [vmem:[#allocation5 + $0x284] ss:$24 sps:$4 sm:$0xff]   ;;  %v3292_v25 = vld [vmem:[#allocation5 + $0x578] ss:$24 sps:$4 sm:$0xff]   ;;  %v3298_v27 = vld [vmem:[#allocation5 + $0x548] ss:$24 sps:$4 sm:$0xff]  }
 0x166   :  { %v1020_v31 = vadd.f32 %v1019_v30, %v977_v28  ;;  %2381 = vmatpush2.bf16.msra.mxu0 %v3223_v12  ;;  %v1028_v33 = vmax.f32 %v1018_v19, 0.0  ;;  %v3295_v12 = vld [vmem:[#allocation5 + $0x280] ss:$24 sps:$4 sm:$0xff]   ;;  %v3300_v13 = vld [vmem:[#allocation5 + $0x54c] ss:$24 sps:$4 sm:$0xff]  }
 0x167   :  { %2382 = vmatprep.subr.bf16.mxu0 %v3231_v26  ;;  %v3303_v26 = vld [vmem:[#allocation5 + $0x254] ss:$24 sps:$4 sm:$0xff]   ;;  %v3301_v19 = vld [vmem:[#allocation5 + $0x250] ss:$24 sps:$4 sm:$0xff]   ;;  %v3309_v29 = vld [vmem:[#allocation5 + $0x224] ss:$24 sps:$4 sm:$0xff]  }
 0x168   :  { %v1029_v36 = vmax.f32 %v1020_v31, 0.0  ;;  %v3526_v42 = vpack.c.bf16 %v1028_v33, %v1024_v37  ;;  %v3306_v28 = vld [vmem:[#allocation5 + $0x51c] ss:$24 sps:$4 sm:$0xff]   ;;  %v3304_v30 = vld [vmem:[#allocation5 + $0x518] ss:$24 sps:$4 sm:$0xff]  }
 0x169   :  { %v3307_v31 = vld [vmem:[#allocation5 + $0x220] ss:$24 sps:$4 sm:$0xff]   ;;  %v3315_v33 = vld [vmem:[#allocation5 + $0x1f4] ss:$24 sps:$4 sm:$0xff]   ;;  %v3321_v37 = vld [vmem:[#allocation5 + $0x1c4] ss:$24 sps:$4 sm:$0xff]  }
 0x16a   :  { %v3524_v38 = vpack.c.bf16 %v1029_v36, %v1025_v35  ;;  %2383 = vmatpush2.bf16.msra.mxu0 %v3229_v32  ;;  %v3312_v32 = vld [vmem:[#allocation5 + $0x4ec] ss:$24 sps:$4 sm:$0xff]   ;;  %v3313_v35 = vld [vmem:[#allocation5 + $0x1f0] ss:$24 sps:$4 sm:$0xff]   ;;  %v3318_v36 = vld [vmem:[#allocation5 + $0x4bc] ss:$24 sps:$4 sm:$0xff]  }
 0x16b   :  { %2438 = vmatprep.subr.bf16.mxu0 %v3237_v34  ;;  %v3310_v34 = vld [vmem:[#allocation5 + $0x4e8] ss:$24 sps:$4 sm:$0xff]  }
 0x16c   :  { %2341 = vmatprep.mubr.bf16.mxu1 %v3524_v38 }
 0x16d   :  { %2385 = vmatmul.mubr.bf16.vlgmr.msra.gmra.mxu0 %v3511_v43  ;;  %2342 = vmatmul.mubr.bf16.vlgmr.msra.gmra.mxu1 %v3526_v42 }
 0x16e   :  { %2396 = vmatpush1.bf16.msra.mxu1 %v3232_v39  ;;  %2439 = vmatpush1.bf16.msra.mxu0 %v3235_v40  ;;  %v3316_v39 = vld [vmem:[#allocation5 + $0x4b8] ss:$24 sps:$4 sm:$0xff]  }
 0x16f   :  { %2470 = vmatprep.mubr.bf16.mxu0 %v3509_v41  ;;  %2427 = vmatprep.mubr.bf16.mxu1 %v3524_v38  ;;  %v3258_v41 = vld [vmem:[#allocation5 + $0x39c] ss:$24 sps:$4 sm:$0xff]   ;;  %v3319_v40 = vld [vmem:[#allocation5 + $0x1c0] ss:$24 sps:$4 sm:$0xff]  }
 0x170   :  { %2397 = vmatprep.subr.bf16.mxu1 %v3240_v44  ;;  %2440 = vmatprep.subr.bf16.mxu0 %v3243_v45  ;;  %v3324_v44 = vld [vmem:[#allocation5 + $0x48c] ss:$24 sps:$4 sm:$0xff]  }
 0x171   :  { %v3327_v45 = vld [vmem:[#allocation5 + $0x194] ss:$24 sps:$4 sm:$0xff]  }
 0x172   :  { %2398 = vmatpush1.bf16.msra.mxu1 %v3238_v46  ;;  %2441 = vmatpush1.bf16.msra.mxu0 %v3241_v47  ;;  %v3322_v46 = vld [vmem:[#allocation5 + $0x488] ss:$24 sps:$4 sm:$0xff]  }
 0x173   :  { %2399 = vmatprep.subr.bf16.mxu1 %v3246_v48  ;;  %2442 = vmatprep.subr.bf16.mxu0 %v3249_v49  ;;  %v3325_v47 = vld [vmem:[#allocation5 + $0x190] ss:$24 sps:$4 sm:$0xff]   ;;  %v3330_v48 = vld [vmem:[#allocation5 + $0x464] ss:$24 sps:$4 sm:$0xff]   ;;  %v3328_v49 = vld [vmem:[#allocation5 + $0x460] ss:$24 sps:$4 sm:$0xff]  }
 0x176   :  { %2400 = vmatpush1.bf16.msra.mxu1 %v3244_v50  ;;  %2443 = vmatpush1.bf16.msra.mxu0 %v3247_v51  ;;  %v3333_v50 = vld [vmem:[#allocation5 + $0x434] ss:$24 sps:$4 sm:$0xff]   ;;  %v3331_v51 = vld [vmem:[#allocation5 + $0x430] ss:$24 sps:$4 sm:$0xff]  }
 0x177   :  { %2401 = vmatprep.subr.bf16.mxu1 %v3252_v52  ;;  %2444 = vmatprep.subr.bf16.mxu0 %v3255_v53  ;;  %v3336_v52 = vld [vmem:[#allocation5 + $0x404] ss:$24 sps:$4 sm:$0xff]   ;;  %v3334_v53 = vld [vmem:[#allocation5 + $0x400] ss:$24 sps:$4 sm:$0xff]  }
 0x17a   :  { %2402 = vmatpush1.bf16.msra.mxu1 %v3250_v54  ;;  %2445 = vmatpush1.bf16.msra.mxu0 %v3253_v55  ;;  %v3339_v54 = vld [vmem:[#allocation5 + $0x3d4] ss:$24 sps:$4 sm:$0xff]   ;;  %v3337_v55 = vld [vmem:[#allocation5 + $0x3d0] ss:$24 sps:$4 sm:$0xff]  }
 0x17b   :  { %2403 = vmatprep.subr.bf16.mxu1 %v3258_v41  ;;  %2446 = vmatprep.subr.bf16.mxu0 %v3261_v56  ;;  %v3342_v41 = vld [vmem:[#allocation5 + $0x3a4] ss:$24 sps:$4 sm:$0xff]   ;;  %v3340_v56 = vld [vmem:[#allocation5 + $0x3a0] ss:$24 sps:$4 sm:$0xff]  }
 0x17e   :  { %2404 = vmatpush1.bf16.msra.mxu1 %v3256_v57  ;;  %2447 = vmatpush1.bf16.msra.mxu0 %v3259_v58  ;;  %v3345_v57 = vld [vmem:[#allocation5 + $0x374] ss:$24 sps:$4 sm:$0xff]   ;;  %v3348_v58 = vld [vmem:[#allocation5 + $0x344] ss:$24 sps:$4 sm:$0xff]  }
 0x17f   :  { %2405 = vmatprep.subr.bf16.mxu1 %v3264_v59  ;;  %2448 = vmatprep.subr.bf16.mxu0 %v3267_v60  ;;  %v3351_v59 = vld [vmem:[#allocation5 + $0x314] ss:$24 sps:$4 sm:$0xff]   ;;  %v3349_v60 = vld [vmem:[#allocation5 + $0x310] ss:$24 sps:$4 sm:$0xff]  }
 0x182   :  { %2406 = vmatpush1.bf16.msra.mxu1 %v3262_v61  ;;  %2449 = vmatpush1.bf16.msra.mxu0 %v3265_v62  ;;  %v3354_v61 = vld [vmem:[#allocation5 + $0x5e4] ss:$24 sps:$4 sm:$0xff]   ;;  %v3352_v62 = vld [vmem:[#allocation5 + $0x5e0] ss:$24 sps:$4 sm:$0xff]  }
 0x183   :  { %2407 = vmatprep.subr.bf16.mxu1 %v3270_v63  ;;  %2450 = vmatprep.subr.bf16.mxu0 %v3273_v0  ;;  %v3357_v63 = vld [vmem:[#allocation5 + $0x5b4] ss:$24 sps:$4 sm:$0xff]   ;;  %v3355_v0 = vld [vmem:[#allocation5 + $0x5b0] ss:$24 sps:$4 sm:$0xff]  }
 0x186   :  { %2408 = vmatpush1.bf16.msra.mxu1 %v3268_v1  ;;  %2451 = vmatpush1.bf16.msra.mxu0 %v3271_v2  ;;  %v3360_v1 = vld [vmem:[#allocation5 + $0x584] ss:$24 sps:$4 sm:$0xff]   ;;  %v3358_v2 = vld [vmem:[#allocation5 + $0x580] ss:$24 sps:$4 sm:$0xff]  }
 0x187   :  { %2409 = vmatprep.subr.bf16.mxu1 %v3276_v5  ;;  %2452 = vmatprep.subr.bf16.mxu0 %v3279_v6  ;;  %v3363_v5 = vld [vmem:[#allocation5 + $0x554] ss:$24 sps:$4 sm:$0xff]   ;;  %v3361_v6 = vld [vmem:[#allocation5 + $0x550] ss:$24 sps:$4 sm:$0xff]  }
 0x18a   :  { %2410 = vmatpush1.bf16.msra.mxu1 %v3274_v7  ;;  %2453 = vmatpush1.bf16.msra.mxu0 %v3277_v8  ;;  %v3366_v7 = vld [vmem:[#allocation5 + $0x524] ss:$24 sps:$4 sm:$0xff]   ;;  %v3364_v8 = vld [vmem:[#allocation5 + $0x520] ss:$24 sps:$4 sm:$0xff]  }
 0x18b   :  { %2411 = vmatprep.subr.bf16.mxu1 %v3282_v9  ;;  %2454 = vmatprep.subr.bf16.mxu0 %v3285_v10  ;;  %v3369_v9 = vld [vmem:[#allocation5 + $0x4f4] ss:$24 sps:$4 sm:$0xff]   ;;  %v3367_v10 = vld [vmem:[#allocation5 + $0x4f0] ss:$24 sps:$4 sm:$0xff]  }
 0x18e   :  { %2412 = vmatpush2.bf16.msra.mxu1 %v3280_v11  ;;  %2455 = vmatpush2.bf16.msra.mxu0 %v3283_v14  ;;  %v3372_v11 = vld [vmem:[#allocation5 + $0x4c4] ss:$24 sps:$4 sm:$0xff]   ;;  %v3370_v14 = vld [vmem:[#allocation5 + $0x4c0] ss:$24 sps:$4 sm:$0xff]  }
 0x18f   :  { %2413 = vmatprep.subr.bf16.mxu1 %v3288_v15  ;;  %2456 = vmatprep.subr.bf16.mxu0 %v3291_v16  ;;  %v3375_v15 = vld [vmem:[#allocation5 + $0x494] ss:$24 sps:$4 sm:$0xff]   ;;  %v3373_v16 = vld [vmem:[#allocation5 + $0x490] ss:$24 sps:$4 sm:$0xff]  }
 0x192   :  { %2414 = vmatpush2.bf16.msra.mxu1 %v3286_v21  ;;  %2457 = vmatpush2.bf16.msra.mxu0 %v3289_v22  ;;  %v1254_v22 = vld [vmem:[%s3590_s4] sm:$0x3f] }
 0x193   :  { %2415 = vmatprep.subr.bf16.mxu1 %v3294_v23  ;;  %2458 = vmatprep.subr.bf16.mxu0 %v3297_v24  ;;  %v1259_v24 = vrot.slane %v1254_v22, %v192_v20 }
 0x196   :  { %2416 = vmatpush2.bf16.msra.mxu1 %v3292_v25  ;;  %2459 = vmatpush2.bf16.msra.mxu0 %v3295_v12  ;;  %v1263_v25 = vrot.slane %v1254_v22, %v196_v18 }
 0x197   :  { %2417 = vmatprep.subr.bf16.mxu1 %v3300_v13  ;;  %2460 = vmatprep.subr.bf16.mxu0 %v3303_v26 }
 0x19a   :  { %2418 = vmatpush2.bf16.msra.mxu1 %v3298_v27  ;;  %2461 = vmatpush2.bf16.msra.mxu0 %v3301_v19 }
 0x19b   :  { %2419 = vmatprep.subr.bf16.mxu1 %v3306_v28  ;;  %2462 = vmatprep.subr.bf16.mxu0 %v3309_v29 }
 0x19e   :  { %2420 = vmatpush2.bf16.msra.mxu1 %v3304_v30  ;;  %2463 = vmatpush2.bf16.msra.mxu0 %v3307_v31 }
 0x19f   :  { %2421 = vmatprep.subr.bf16.mxu1 %v3312_v32  ;;  %2464 = vmatprep.subr.bf16.mxu0 %v3315_v33 }
 0x1a2   :  { %2422 = vmatpush2.bf16.msra.mxu1 %v3310_v34  ;;  %2465 = vmatpush2.bf16.msra.mxu0 %v3313_v35 }
 0x1a3   :  { %2423 = vmatprep.subr.bf16.mxu1 %v3318_v36  ;;  %2466 = vmatprep.subr.bf16.mxu0 %v3321_v37 }
 0x1a6   :  { %2424 = vmatpush2.bf16.msra.mxu1 %v3316_v39  ;;  %2467 = vmatpush2.bf16.msra.mxu0 %v3319_v40 }
 0x1a7   :  { %2425 = vmatprep.subr.bf16.mxu1 %v3324_v44  ;;  %2468 = vmatprep.subr.bf16.mxu0 %v3327_v45  ;;  %v1267_v44 = vrot.slane %v1254_v22, %v200_v4  ;;  %v1271_v45 = vrot.slane %v1254_v22, %v204_v3 }
 0x1aa   :  { %2426 = vmatpush2.bf16.msra.mxu1 %v3322_v46  ;;  %2469 = vmatpush2.bf16.msra.mxu0 %v3325_v47 }
 0x1ab   :  { %2481 = vmatprep.subr.bf16.mxu1 %v3330_v48 }
 0x1ad   :  { %2428 = vmatmul.mubr.bf16.vlgmr.msra.gmra.mxu1 %v3526_v42  ;;  %2471 = vmatmul.mubr.bf16.vlgmr.msra.gmra.mxu0 %v3511_v43  ;;  %v3343_v43 = vld [vmem:[#allocation5 + $0x370] ss:$24 sps:$4 sm:$0xff]  }
 0x1ae   :  { %2482 = vmatpush1.bf16.msra.mxu1 %v3328_v49  ;;  %2513 = vmatprep.mubr.bf16.mxu1 %v3524_v38  ;;  %v3346_v38 = vld [vmem:[#allocation5 + $0x340] ss:$24 sps:$4 sm:$0xff]  }
 0x1af   :  { %2483 = vmatprep.subr.bf16.mxu1 %v3333_v50 }
 0x1b2   :  { %2484 = vmatpush1.bf16.msra.mxu1 %v3331_v51 }
 0x1b3   :  { %2485 = vmatprep.subr.bf16.mxu1 %v3336_v52 }
 0x1b6   :  { %2486 = vmatpush1.bf16.msra.mxu1 %v3334_v53 }
 0x1b7   :  { %2487 = vmatprep.subr.bf16.mxu1 %v3339_v54 }
 0x1ba   :  { %2488 = vmatpush1.bf16.msra.mxu1 %v3337_v55 }
 0x1bb   :  { %2489 = vmatprep.subr.bf16.mxu1 %v3342_v41 }
 0x1be   :  { %2490 = vmatpush1.bf16.msra.mxu1 %v3340_v56 }
 0x1bf   :  { %2491 = vmatprep.subr.bf16.mxu1 %v3345_v57 }
 0x1c2   :  { %2492 = vmatpush1.bf16.msra.mxu1 %v3343_v43 }
 0x1c3   :  { %2493 = vmatprep.subr.bf16.mxu1 %v3348_v58 }
 0x1c6   :  { %2494 = vmatpush1.bf16.msra.mxu1 %v3346_v38 }
 0x1c7   :  { %2495 = vmatprep.subr.bf16.mxu1 %v3351_v59 }
 0x1ca   :  { %2496 = vmatpush1.bf16.msra.mxu1 %v3349_v60  ;;  %v1274_v60 = vsub.s32 4, %v3494_v17 }
 0x1cb   :  { %2497 = vmatprep.subr.bf16.mxu1 %v3354_v61  ;;  %v1278_v61 = vsub.s32 5, %v3494_v17 }
 0x1ce   :  { %2498 = vmatpush2.bf16.msra.mxu1 %v3352_v62 }
 0x1cf   :  { %2499 = vmatprep.subr.bf16.mxu1 %v3357_v63  ;;  %v1275_v63 = vrot.slane %v1254_v22, %v1274_v60 }
 0x1d2   :  { %2500 = vmatpush2.bf16.msra.mxu1 %v3355_v0  ;;  %v1279_v0 = vrot.slane %v1254_v22, %v1278_v61 }
 0x1d3   :  { %2501 = vmatprep.subr.bf16.mxu1 %v3360_v1 }
 0x1d6   :  { %2502 = vmatpush2.bf16.msra.mxu1 %v3358_v2 }
 0x1d7   :  { %2503 = vmatprep.subr.bf16.mxu1 %v3363_v5 }
 0x1da   :  { %2504 = vmatpush2.bf16.msra.mxu1 %v3361_v6 }
 0x1db   :  { %2505 = vmatprep.subr.bf16.mxu1 %v3366_v7 }
 0x1de   :  { %2506 = vmatpush2.bf16.msra.mxu1 %v3364_v8 }
 0x1df   :  { %2507 = vmatprep.subr.bf16.mxu1 %v3369_v9 }
 0x1e2   :  { %2508 = vmatpush2.bf16.msra.mxu1 %v3367_v10 }
 0x1e3   :  { %2509 = vmatprep.subr.bf16.mxu1 %v3372_v11 }
 0x1e6   :  { %2510 = vmatpush2.bf16.msra.mxu1 %v3370_v14 }
 0x1e7   :  { %2511 = vmatprep.subr.bf16.mxu1 %v3375_v15 }
 0x1ea   :  { %2512 = vmatpush2.bf16.msra.mxu1 %v3373_v16 }
 0x1ed   :  { %2514 = vmatmul.mubr.bf16.vlgmr.msra.gmra.mxu1 %v3526_v42  ;;  %v2300_v21 = vpop.f32.mrf.mxu0 }
 0x1ee   :  { %v2301_v13 = vadd.f32 %v2300_v21, %v1259_v24 }
 0x1ef   :  { %v2302_v23 = vpop.f32.mrf.mxu0 }
 0x1f0   :  { %v2303_v27 = vadd.f32 %v2302_v23, %v1263_v25 }
 0x1f1   :  { %v2304_v12 = vpop.f32.mrf.mxu0 }
 0x1f2   :  { %v2305_v42 = vadd.f32 %v2304_v12, %v1259_v24 }
 0x1f3   :  { %v2306_v28 = vpop.f32.mrf.mxu0 }
 0x1f4   :  { %v2307_v33 = vadd.f32 %v2306_v28, %v1263_v25 }
 0x22d   :  { %v2343_v26 = vpop.f32.mrf.mxu1  ;;  %v2386_v39 = vpop.f32.mrf.mxu0 }
 0x22e   :  { %v2344_v19 = vadd.f32 %v2343_v26, %v2301_v13  ;;  %v2387_v47 = vadd.f32 %v2386_v39, %v1267_v44 }
 0x22f   :  { %v2345_v29 = vpop.f32.mrf.mxu1  ;;  %v2388_v40 = vpop.f32.mrf.mxu0 }
 0x230   :  { %v2524_v30 = vmax.f32 %v2344_v19, 0.0  ;;  %v2346_v31 = vadd.f32 %v2345_v29, %v2303_v27  ;;  %v2389_v49 = vadd.f32 %v2388_v40, %v1271_v45 }
 0x231   :  { %v2347_v32 = vpop.f32.mrf.mxu1  ;;  %v2390_v46 = vpop.f32.mrf.mxu0 }
 0x232   :  { %2536 = vst [vmem:[%s3591_s5] sm:$0xff] %v2524_v30  ;;  %v2525_v20 = vmax.f32 %v2346_v31, 0.0  ;;  %v2348_v34 = vadd.f32 %v2347_v32, %v2305_v42  ;;  %v2391_v53 = vadd.f32 %v2390_v46, %v1267_v44 }
 0x233   :  { %v2349_v35 = vpop.f32.mrf.mxu1  ;;  %v2392_v51 = vpop.f32.mrf.mxu0 }
 0x234   :  { %2537 = vst [vmem:[%s3591_s5 + $0x8] sm:$0xff] %v2525_v20  ;;  %v2530_v18 = vmax.f32 %v2348_v34, 0.0  ;;  %v2350_v36 = vadd.f32 %v2349_v35, %v2307_v33  ;;  %v2393_v56 = vadd.f32 %v2392_v51, %v1271_v45 }
 0x236   :  { %2542 = vst [vmem:[%s3591_s5 + $0x30] sm:$0xff] %v2530_v18  ;;  %v2531_v37 = vmax.f32 %v2350_v36, 0.0 }
 0x238   :  { %2543 = vst [vmem:[%s3591_s5 + $0x38] sm:$0xff] %v2531_v37 }
 0x26d   :  { %v2429_v48 = vpop.f32.mrf.mxu1  ;;  %v2472_v59 = vpop.f32.mrf.mxu0 }
 0x26e   :  { %v2430_v50 = vadd.f32 %v2429_v48, %v2387_v47  ;;  %v2473_v2 = vadd.f32 %v2472_v59, %v1275_v63 }
 0x26f   :  { %v2431_v52 = vpop.f32.mrf.mxu1  ;;  %v2474_v62 = vpop.f32.mrf.mxu0 }
 0x270   :  { %v2526_v54 = vmax.f32 %v2430_v50, 0.0  ;;  %v2432_v55 = vadd.f32 %v2431_v52, %v2389_v49  ;;  %v2475_v6 = vadd.f32 %v2474_v62, %v1279_v0 }
 0x271   :  { %v2433_v41 = vpop.f32.mrf.mxu1  ;;  %v2476_v1 = vpop.f32.mrf.mxu0 }
 0x272   :  { %2538 = vst [vmem:[%s3591_s5 + $0x10] sm:$0xff] %v2526_v54  ;;  %v2527_v4 = vmax.f32 %v2432_v55, 0.0  ;;  %v2434_v57 = vadd.f32 %v2433_v41, %v2391_v53  ;;  %v2477_v10 = vadd.f32 %v2476_v1, %v1275_v63 }
 0x273   :  { %v2435_v43 = vpop.f32.mrf.mxu1  ;;  %v2478_v8 = vpop.f32.mrf.mxu0 }
 0x274   :  { %2539 = vst [vmem:[%s3591_s5 + $0x18] sm:$0xff] %v2527_v4  ;;  %v2532_v3 = vmax.f32 %v2434_v57, 0.0  ;;  %v2436_v58 = vadd.f32 %v2435_v43, %v2393_v56  ;;  %v2479_v16 = vadd.f32 %v2478_v8, %v1279_v0 }
 0x276   :  { %2544 = vst [vmem:[%s3591_s5 + $0x40] sm:$0xff] %v2532_v3  ;;  %v2533_v38 = vmax.f32 %v2436_v58, 0.0 }
 0x278   :  { %2545 = vst [vmem:[%s3591_s5 + $0x48] sm:$0xff] %v2533_v38 }
 0x2ad   :  { %v2515_v5 = vpop.f32.mrf.mxu1 }
 0x2ae   :  { %v2516_v7 = vadd.f32 %v2515_v5, %v2473_v2 }
 0x2af   :  { %v2517_v9 = vpop.f32.mrf.mxu1 }
 0x2b0   :  { %v2528_v11 = vmax.f32 %v2516_v7, 0.0  ;;  %v2518_v14 = vadd.f32 %v2517_v9, %v2475_v6 }
 0x2b1   :  { %v2519_v15 = vpop.f32.mrf.mxu1 }
 0x2b2   :  { %2540 = vst [vmem:[%s3591_s5 + $0x20] sm:$0xff] %v2528_v11  ;;  %v2529_v17 = vmax.f32 %v2518_v14, 0.0  ;;  %v2520_v21 = vadd.f32 %v2519_v15, %v2477_v10 }
 0x2b3   :  { %v2521_v23 = vpop.f32.mrf.mxu1 }
 0x2b4   :  { %2541 = vst [vmem:[%s3591_s5 + $0x28] sm:$0xff] %v2529_v17  ;;  %v2534_v22 = vmax.f32 %v2520_v21, 0.0  ;;  %v2522_v24 = vadd.f32 %v2521_v23, %v2479_v16 }
 0x2b6   :  { %2546 = vst [vmem:[%s3591_s5 + $0x50] sm:$0xff] %v2534_v22  ;;  %v2535_v25 = vmax.f32 %v2522_v24, 0.0 }
 0x2b8   :  { %2547 = vst [vmem:[%s3591_s5 + $0x58] sm:$0xff] %v2535_v25 }
 0x2b9   :  { %2552 = vsyncpa [#allocation4], 1 }
 0x2ba   :  { %2553 = vsyncpa [#allocation6], 1 }

</bundles_post_ra>
